<compile_context>
chip_gen: v5e
topology: v5e:2x2
jax: 0.10.0
libtpu: 0.0.40
codegen_flags: <defaults>
</compile_context>

<pallas_src>
import jax
import jax.numpy as jnp
import numpy as np
from jax import lax
from jax.experimental import pallas as pl
from jax.experimental.pallas import tpu as pltpu

EPS = 1e-5            # torch.nn.BatchNorm2d default eps
LANE = 128
# f32 keeps the kernel bit-comparable with the f32 reference below; set to
# jnp.bfloat16 on v6e/v7x for ~2x MXU throughput and half the matmul DMA.
DEFAULT_COMPUTE_DTYPE = jnp.float32


def _round_up(x, m):
    return (x + m - 1) // m * m


def _pick_tile_h(H, W, Cp):
    """Largest row-tile that divides H while keeping the per-tile VMEM
    footprint (double-buffered halo slab + im2col patch + in/out blocks)
    comfortably inside every generation's VMEM (incl. v7x's 64 MiB)."""
    budget = 4 << 20
    best = 1
    for th in range(1, H + 1):
        if H % th:
            continue
        need = (2 * (th + 2) * (W + 2) * Cp      # double-buffered input slab
                + th * W * 9 * Cp                # im2col patch
                + 4 * th * W * Cp) * 4           # out / residual / accum blocks
        if need <= budget:
            best = th
    return best


def _make_bnrelu_conv_kernel(*, TH, H, W, Cp, nH, add_residual, compute_dtype):
    Wp2 = W + 2

    def kernel(*refs):
        if add_residual:
            (x_hbm, scale_ref, shift_ref, w_ref, res_ref,
             out_ref, slab_ref, sem_ref) = refs
        else:
            (x_hbm, scale_ref, shift_ref, w_ref,
             out_ref, slab_ref, sem_ref) = refs
            res_ref = None

        n = pl.program_id(0)     # batch index    ("parallel")
        i = pl.program_id(1)     # row-tile index ("arbitrary": sequential per core)
        h0 = i * TH              # first padded row of this tile's slab

        def halo_dma(row_tile, slot):
            # Contiguous (TH+2, W+2, Cp) row slab of image n from HBM.
            return pltpu.make_async_copy(
                x_hbm.at[n, pl.ds(row_tile * TH, TH + 2)],
                slab_ref.at[slot],
                sem_ref.at[slot])

        # Prime the double buffer on the first row-tile of this image.
        @pl.when(i == 0)
        def _():
            halo_dma(i, 0).start()

        slot = i % 2
        halo_dma(i, slot).wait()

        # Prefetch the next row-tile's slab while computing on this one.
        @pl.when(i + 1 < nH)
        def _():
            halo_dma(i + 1, 1 - slot).start()

        x = slab_ref[slot]                                 # (TH+2, W+2, Cp) f32

        # Fused BatchNorm (precomputed scale/shift) + ReLU; broadcast once.
        scale = scale_ref[...].reshape(1, 1, Cp)
        shift = shift_ref[...].reshape(1, 1, Cp)
        a = jnp.maximum(x * scale + shift, 0.0)

        # The conv's zero padding must remain zero *after* BN+ReLU, so zero the
        # 1-pixel border of the original image (interior tile halos are kept).
        col = lax.broadcasted_iota(jnp.int32, (TH + 2, Wp2, Cp), 1)
        row = lax.broadcasted_iota(jnp.int32, (TH + 2, Wp2, Cp), 0) + h0
        interior = (col >= 1) & (col <= W) & (row >= 1) & (row <= H)
        a = jnp.where(interior, a, 0.0)

        # im2col: one deep (TH*W, 9*Cp) x (9*Cp, Cp) matmul instead of 9
        # shallow per-tap matmuls.
        taps = [a[ky:ky + TH, kx:kx + W, :]
                for ky in range(3) for kx in range(3)]
        patch = jnp.concatenate(taps, axis=-1).reshape(TH * W, 9 * Cp)
        y = jnp.dot(patch.astype(compute_dtype), w_ref[...],
                    preferred_element_type=jnp.float32)
        y = y.reshape(1, TH, W, Cp)
        if add_residual:
            y = y + res_ref[...]
        out_ref[...] = y.astype(out_ref.dtype)

    return kernel


def _bnrelu_conv(t, scale, shift, wmat, residual, TH, compute_dtype):
    """relu(t*scale + shift) -> 3x3 conv (pad=1, no bias) [-> + residual], NHWC."""
    N, H, W, Cp = t.shape
    assert H % TH == 0, "tile_h must divide H"
    nH = H // TH
    tpad = jnp.pad(t, ((0, 0), (1, 1), (1, 1), (0, 0)))   # conv zero padding
    add_residual = residual is not None

    kernel = _make_bnrelu_conv_kernel(TH=TH, H=H, W=W, Cp=Cp, nH=nH,
                                      add_residual=add_residual,
                                      compute_dtype=compute_dtype)

    in_specs = [
        pl.BlockSpec(memory_space=pl.ANY),                   # padded input (HBM)
        pl.BlockSpec((1, Cp), lambda n, i: (0, 0)),          # BN scale
        pl.BlockSpec((1, Cp), lambda n, i: (0, 0)),          # BN shift
        pl.BlockSpec((9 * Cp, Cp), lambda n, i: (0, 0)),     # im2col weights
    ]
    args = [tpad, scale, shift, wmat.astype(compute_dtype)]
    if add_residual:
        in_specs.append(pl.BlockSpec((1, TH, W, Cp), lambda n, i: (n, i, 0, 0)))
        args.append(residual)

    flops = 2 * N * H * W * 9 * Cp * Cp
    bytes_accessed = 4 * (tpad.size + wmat.size + 2 * Cp
                          + (2 if add_residual else 1) * N * H * W * Cp)

    return pl.pallas_call(
        kernel,
        out_shape=jax.ShapeDtypeStruct((N, H, W, Cp), jnp.float32),
        grid=(N, nH),
        in_specs=in_specs,
        out_specs=pl.BlockSpec((1, TH, W, Cp), lambda n, i: (n, i, 0, 0)),
        scratch_shapes=[
            pltpu.VMEM((2, TH + 2, W + 2, Cp), jnp.float32),  # halo slab x2
            pltpu.SemaphoreType.DMA((2,)),
        ],
        compiler_params=pltpu.CompilerParams(
            dimension_semantics=("parallel", "arbitrary")),
        cost_estimate=pl.CostEstimate(flops=int(flops), transcendentals=0,
                                      bytes_accessed=int(bytes_accessed)),
    )(*args)


def _bn_affine(t, gamma_p, beta_p):
    """Training-mode BN (biased batch var) folded into per-channel scale/shift."""
    m = jnp.mean(t, axis=(0, 1, 2))
    v = jnp.mean(jnp.square(t - m), axis=(0, 1, 2))
    scale = gamma_p * lax.rsqrt(v + EPS)
    shift = beta_p - m * scale
    Cp = t.shape[-1]
    return (scale.reshape(1, Cp).astype(jnp.float32),
            shift.reshape(1, Cp).astype(jnp.float32))


def _repack_conv_weight(w, C, Cp):
    """PyTorch (Cout, Cin, 3, 3) -> (9*Cp, Cp) im2col weight, zero-padded."""
    wt = jnp.transpose(w, (2, 3, 1, 0)).astype(jnp.float32)   # (3,3,Cin,Cout)
    wt = jnp.pad(wt, ((0, 0), (0, 0), (0, Cp - C), (0, Cp - C)))
    return wt.reshape(9 * Cp, Cp)


def _pad_vec(v, Cp):
    return jnp.pad(v.astype(jnp.float32), (0, Cp - v.shape[0]))


def base_block(x_nchw, w1, w2, g1, b1, g2, b2, *, tile_h=None,
               compute_dtype=DEFAULT_COMPUTE_DTYPE):
    """Forward pass of BaseBlock (stride=1, downsample=None, in_ch==out_ch)."""
    N, C, H, W = x_nchw.shape
    Cp = _round_up(C, LANE)
    TH = tile_h if tile_h is not None else _pick_tile_h(H, W, Cp)

    # NCHW -> NHWC (channels on the 128-lane axis), zero-pad channels to Cp.
    x = jnp.transpose(x_nchw, (0, 2, 3, 1)).astype(jnp.float32)
    x = jnp.pad(x, ((0, 0), (0, 0), (0, 0), (0, Cp - C)))

    w1m = _repack_conv_weight(w1, C, Cp)
    w2m = _repack_conv_weight(w2, C, Cp)
    g1p, b1p = _pad_vec(g1, Cp), _pad_vec(b1, Cp)
    g2p, b2p = _pad_vec(g2, Cp), _pad_vec(b2, Cp)

    # BN batch statistics as cheap XLA reductions, folded into per-channel
    # scale/shift so the tiled kernels only do normalize + ReLU + conv.
    # TODO(synk): PyTorch train-mode BN also updates running_mean/running_var;
    # that stateful side effect is not reproduced here.
    s1, t1 = _bn_affine(x, g1p, b1p)
    y1 = _bnrelu_conv(x, s1, t1, w1m, residual=None, TH=TH,
                      compute_dtype=compute_dtype)
    s2, t2 = _bn_affine(y1, g2p, b2p)
    y2 = _bnrelu_conv(y1, s2, t2, w2m, residual=x, TH=TH,
                      compute_dtype=compute_dtype)

    return jnp.transpose(y2[..., :C], (0, 3, 1, 2))           # back to NCHW


# Pure-JAX reference (mirrors the PyTorch forward in train mode).
def reference(x, w1, w2, g1, b1, g2, b2):
    def bn_relu(t, g, beta):
        m = t.mean(axis=(0, 2, 3), keepdims=True)
        v = ((t - m) ** 2).mean(axis=(0, 2, 3), keepdims=True)
        y = (t - m) * lax.rsqrt(v + EPS) * g.reshape(1, -1, 1, 1) \
            + beta.reshape(1, -1, 1, 1)
        return jnp.maximum(y, 0.0)

    def conv(t, w):
        return lax.conv_general_dilated(t, w, (1, 1), ((1, 1), (1, 1)),
                                        dimension_numbers=("NCHW", "OIHW", "NCHW"))

    out = bn_relu(x, g1, b1)
    out = conv(out, w1)
    out = bn_relu(out, g2, b2)
    out = conv(out, w2)
    return out + x


if __name__ == "__main__":
    key = jax.random.PRNGKey(0)
    N, C, H, W = 2, 4, 16, 16
    kx, k1, k2 = jax.random.split(key, 3)

    x = jax.random.normal(kx, (N, C, H, W), jnp.float32)
    w1 = jax.random.normal(k1, (C, C, 3, 3), jnp.float32) * 0.1
    w2 = jax.random.normal(k2, (C, C, 3, 3), jnp.float32) * 0.1
    g1 = jnp.ones((C,), jnp.float32)   # BatchNorm2d default affine init
    b1 = jnp.zeros((C,), jnp.float32)
    g2 = jnp.ones((C,), jnp.float32)
    b2 = jnp.zeros((C,), jnp.float32)

    ref = jax.block_until_ready(reference(x, w1, w2, g1, b1, g2, b2))
    # tile_h=8 exercises the multi-tile halo + prefetch path (grid=(2,2));
    # tile_h=None exercises the auto-picked single-tile path (grid=(2,1)).
    for th in (8, None):
        out = jax.block_until_ready(
            base_block(x, w1, w2, g1, b1, g2, b2, tile_h=th))
        np.testing.assert_allclose(np.asarray(out), np.asarray(ref),
                                   rtol=1e-4, atol=1e-4)
    print("KERNEL_OK")
</pallas_src>

<mosaic_0001>
module attributes {stable_mosaic.version = 11 : i64} {
  func.func @kernel(%arg0: i32, %arg1: i32, %arg2: memref<2x18x18x128xf32, #tpu.memory_space<any>>, %arg3: memref<1x128xf32, #tpu.memory_space<vmem>>, %arg4: memref<1x128xf32, #tpu.memory_space<vmem>>, %arg5: memref<1152x128xf32, #tpu.memory_space<vmem>>, %arg6: memref<1x8x16x128xf32, #tpu.memory_space<vmem>>, %arg7: memref<2x10x18x128xf32, #tpu.memory_space<vmem>>, %arg8: memref<2x!tpu.dma_semaphore, #tpu.memory_space<semaphore_mem>>) attributes {dimension_semantics = [#tpu.dimension_semantics<parallel>, #tpu.dimension_semantics<arbitrary>], iteration_bounds = array<i64: 2, 2>, scalar_prefetch = 0 : i64, scratch_operands = 2 : i64, tpu.core_type = #tpu.core_type<tc>, window_params = [{}, {pipeline_mode = #tpu.pipeline_mode<synchronous>, transform_indices = @transform_1, window_bounds = array<i64: 1, 128>}, {pipeline_mode = #tpu.pipeline_mode<synchronous>, transform_indices = @transform_2, window_bounds = array<i64: 1, 128>}, {pipeline_mode = #tpu.pipeline_mode<synchronous>, transform_indices = @transform_3, window_bounds = array<i64: 1152, 128>}, {transform_indices = @transform_4, window_bounds = array<i64: 1, 8, 16, 128>}]} {
    %c8_i32 = arith.constant 8 : i32
    %0 = arith.muli %arg1, %c8_i32 : i32
    %c0_i32 = arith.constant 0 : i32
    %1 = arith.cmpi eq, %arg1, %c0_i32 : i32
    %2 = arith.extui %1 : i1 to i32
    %c0_i32_0 = arith.constant 0 : i32
    %3 = arith.cmpi ne, %2, %c0_i32_0 : i32
    scf.if %3 {
      %c8_i32_31 = arith.constant 8 : i32
      %70 = arith.muli %arg1, %c8_i32_31 : i32
      %c0_i32_32 = arith.constant 0 : i32
      %c0_i32_33 = arith.constant 0 : i32
      %c0_i32_34 = arith.constant 0 : i32
      %c0_i32_35 = arith.constant 0 : i32
      %71 = tpu.memref_slice %arg2[%arg0, %70, %c0_i32_34, %c0_i32_35] : memref<2x18x18x128xf32, #tpu.memory_space<any>> -> memref<1x10x18x128xf32, #tpu.memory_space<any>>
      %72 = tpu.memref_squeeze %71 : memref<1x10x18x128xf32, #tpu.memory_space<any>> -> memref<10x18x128xf32, #tpu.memory_space<any>>
      %c0_i32_36 = arith.constant 0 : i32
      %c0_i32_37 = arith.constant 0 : i32
      %c0_i32_38 = arith.constant 0 : i32
      %73 = tpu.memref_slice %arg7[%c0_i32_32, %c0_i32_36, %c0_i32_37, %c0_i32_38] : memref<2x10x18x128xf32, #tpu.memory_space<vmem>> -> memref<1x10x18x128xf32, #tpu.memory_space<vmem>>
      %74 = tpu.memref_squeeze %73 : memref<1x10x18x128xf32, #tpu.memory_space<vmem>> -> memref<10x18x128xf32, #tpu.memory_space<vmem>>
      %75 = tpu.memref_slice %arg8[%c0_i32_33] : memref<2x!tpu.dma_semaphore, #tpu.memory_space<semaphore_mem>> -> memref<1x!tpu.dma_semaphore, #tpu.memory_space<semaphore_mem>>
      %76 = tpu.memref_squeeze %75 : memref<1x!tpu.dma_semaphore, #tpu.memory_space<semaphore_mem>> -> memref<!tpu.dma_semaphore, #tpu.memory_space<semaphore_mem>>
      tpu.enqueue_dma source(%72 : memref<10x18x128xf32, #tpu.memory_space<any>>) target(%74 : memref<10x18x128xf32, #tpu.memory_space<vmem>>) target_semaphore(%76 : memref<!tpu.dma_semaphore, #tpu.memory_space<semaphore_mem>>)
    } else {
    }
    %c2_i32 = arith.constant 2 : i32
    %c0_i32_1 = arith.constant 0 : i32
    %4 = arith.cmpi eq, %c2_i32, %c0_i32_1 : i32
    %c1_i32 = arith.constant 1 : i32
    %5 = arith.select %4, %c1_i32, %c2_i32 : i32
    %6 = arith.remsi %arg1, %5 : i32
    %c0_i32_2 = arith.constant 0 : i32
    %7 = arith.cmpi ne, %6, %c0_i32_2 : i32
    %c0_i32_3 = arith.constant 0 : i32
    %8 = arith.cmpi slt, %6, %c0_i32_3 : i32
    %c0_i32_4 = arith.constant 0 : i32
    %9 = arith.cmpi slt, %5, %c0_i32_4 : i32
    %10 = arith.xori %8, %9 : i1
    %11 = arith.andi %10, %7 : i1
    %12 = arith.addi %6, %5 : i32
    %13 = arith.select %11, %12, %6 : i32
    %c8_i32_5 = arith.constant 8 : i32
    %14 = arith.muli %arg1, %c8_i32_5 : i32
    %c0_i32_6 = arith.constant 0 : i32
    %c0_i32_7 = arith.constant 0 : i32
    %15 = tpu.memref_slice %arg2[%arg0, %14, %c0_i32_6, %c0_i32_7] : memref<2x18x18x128xf32, #tpu.memory_space<any>> -> memref<1x10x18x128xf32, #tpu.memory_space<any>>
    %16 = tpu.memref_squeeze %15 : memref<1x10x18x128xf32, #tpu.memory_space<any>> -> memref<10x18x128xf32, #tpu.memory_space<any>>
    %c0_i32_8 = arith.constant 0 : i32
    %c0_i32_9 = arith.constant 0 : i32
    %c0_i32_10 = arith.constant 0 : i32
    %17 = tpu.memref_slice %arg7[%13, %c0_i32_8, %c0_i32_9, %c0_i32_10] : memref<2x10x18x128xf32, #tpu.memory_space<vmem>> -> memref<1x10x18x128xf32, #tpu.memory_space<vmem>>
    %18 = tpu.memref_squeeze %17 : memref<1x10x18x128xf32, #tpu.memory_space<vmem>> -> memref<10x18x128xf32, #tpu.memory_space<vmem>>
    %19 = tpu.memref_slice %arg8[%13] : memref<2x!tpu.dma_semaphore, #tpu.memory_space<semaphore_mem>> -> memref<1x!tpu.dma_semaphore, #tpu.memory_space<semaphore_mem>>
    %20 = tpu.memref_squeeze %19 : memref<1x!tpu.dma_semaphore, #tpu.memory_space<semaphore_mem>> -> memref<!tpu.dma_semaphore, #tpu.memory_space<semaphore_mem>>
    tpu.wait_dma2 semaphore(%20 : memref<!tpu.dma_semaphore, #tpu.memory_space<semaphore_mem>>) src(%16 : memref<10x18x128xf32, #tpu.memory_space<any>>) dst(%18 : memref<10x18x128xf32, #tpu.memory_space<vmem>>)
    %c1_i32_11 = arith.constant 1 : i32
    %21 = arith.addi %arg1, %c1_i32_11 : i32
    %c2_i32_12 = arith.constant 2 : i32
    %22 = arith.cmpi slt, %21, %c2_i32_12 : i32
    %23 = arith.extui %22 : i1 to i32
    %c0_i32_13 = arith.constant 0 : i32
    %24 = arith.cmpi ne, %23, %c0_i32_13 : i32
    scf.if %24 {
      %c1_i32_31 = arith.constant 1 : i32
      %70 = arith.addi %arg1, %c1_i32_31 : i32
      %c1_i32_32 = arith.constant 1 : i32
      %71 = arith.subi %c1_i32_32, %13 : i32
      %c8_i32_33 = arith.constant 8 : i32
      %72 = arith.muli %70, %c8_i32_33 : i32
      %c0_i32_34 = arith.constant 0 : i32
      %c0_i32_35 = arith.constant 0 : i32
      %73 = tpu.memref_slice %arg2[%arg0, %72, %c0_i32_34, %c0_i32_35] : memref<2x18x18x128xf32, #tpu.memory_space<any>> -> memref<1x10x18x128xf32, #tpu.memory_space<any>>
      %74 = tpu.memref_squeeze %73 : memref<1x10x18x128xf32, #tpu.memory_space<any>> -> memref<10x18x128xf32, #tpu.memory_space<any>>
      %c0_i32_36 = arith.constant 0 : i32
      %c0_i32_37 = arith.constant 0 : i32
      %c0_i32_38 = arith.constant 0 : i32
      %75 = tpu.memref_slice %arg7[%71, %c0_i32_36, %c0_i32_37, %c0_i32_38] : memref<2x10x18x128xf32, #tpu.memory_space<vmem>> -> memref<1x10x18x128xf32, #tpu.memory_space<vmem>>
      %76 = tpu.memref_squeeze %75 : memref<1x10x18x128xf32, #tpu.memory_space<vmem>> -> memref<10x18x128xf32, #tpu.memory_space<vmem>>
      %77 = tpu.memref_slice %arg8[%71] : memref<2x!tpu.dma_semaphore, #tpu.memory_space<semaphore_mem>> -> memref<1x!tpu.dma_semaphore, #tpu.memory_space<semaphore_mem>>
      %78 = tpu.memref_squeeze %77 : memref<1x!tpu.dma_semaphore, #tpu.memory_space<semaphore_mem>> -> memref<!tpu.dma_semaphore, #tpu.memory_space<semaphore_mem>>
      tpu.enqueue_dma source(%74 : memref<10x18x128xf32, #tpu.memory_space<any>>) target(%76 : memref<10x18x128xf32, #tpu.memory_space<vmem>>) target_semaphore(%78 : memref<!tpu.dma_semaphore, #tpu.memory_space<semaphore_mem>>)
    } else {
    }
    %25 = arith.index_cast %13 : i32 to index
    %c0 = arith.constant 0 : index
    %c0_14 = arith.constant 0 : index
    %c0_15 = arith.constant 0 : index
    %26 = vector.load %arg7[%25, %c0, %c0_14, %c0_15] : memref<2x10x18x128xf32, #tpu.memory_space<vmem>>, vector<1x10x18x128xf32>
    %27 = vector.shape_cast %26 : vector<1x10x18x128xf32> to vector<10x18x128xf32>
    %c0_16 = arith.constant 0 : index
    %c0_17 = arith.constant 0 : index
    %28 = vector.load %arg3[%c0_16, %c0_17] : memref<1x128xf32, #tpu.memory_space<vmem>>, vector<1x128xf32>
    %29 = vector.shape_cast %28 : vector<1x128xf32> to vector<1x1x128xf32>
    %c0_18 = arith.constant 0 : index
    %c0_19 = arith.constant 0 : index
    %30 = vector.load %arg4[%c0_18, %c0_19] : memref<1x128xf32, #tpu.memory_space<vmem>>, vector<1x128xf32>
    %31 = vector.shape_cast %30 : vector<1x128xf32> to vector<1x1x128xf32>
    %32 = vector.broadcast %29 : vector<1x1x128xf32> to vector<10x18x128xf32>
    %33 = arith.mulf %27, %32 : vector<10x18x128xf32>
    %34 = vector.broadcast %31 : vector<1x1x128xf32> to vector<10x18x128xf32>
    %35 = arith.addf %33, %34 : vector<10x18x128xf32>
    %cst = arith.constant 0.000000e+00 : f32
    %36 = vector.broadcast %cst : f32 to vector<10x18x128xf32>
    %37 = arith.maximumf %35, %36 : vector<10x18x128xf32>
    %38 = tpu.iota {dimensions = array<i32: 1>} : vector<10x18x128xi32>
    %39 = tpu.iota {dimensions = array<i32: 0>} : vector<10x18x128xi32>
    %40 = vector.broadcast %0 : i32 to vector<10x18x128xi32>
    %41 = arith.addi %39, %40 : vector<10x18x128xi32>
    %c1_i32_20 = arith.constant 1 : i32
    %42 = vector.broadcast %c1_i32_20 : i32 to vector<10x18x128xi32>
    %43 = arith.cmpi sge, %38, %42 : vector<10x18x128xi32>
    %c16_i32 = arith.constant 16 : i32
    %44 = vector.broadcast %c16_i32 : i32 to vector<10x18x128xi32>
    %45 = arith.cmpi sle, %38, %44 : vector<10x18x128xi32>
    %46 = arith.andi %43, %45 : vector<10x18x128xi1>
    %c1_i32_21 = arith.constant 1 : i32
    %47 = vector.broadcast %c1_i32_21 : i32 to vector<10x18x128xi32>
    %48 = arith.cmpi sge, %41, %47 : vector<10x18x128xi32>
    %49 = arith.andi %46, %48 : vector<10x18x128xi1>
    %c16_i32_22 = arith.constant 16 : i32
    %50 = vector.broadcast %c16_i32_22 : i32 to vector<10x18x128xi32>
    %51 = arith.cmpi sle, %41, %50 : vector<10x18x128xi32>
    %52 = arith.andi %49, %51 : vector<10x18x128xi1>
    %cst_23 = arith.constant 0.000000e+00 : f32
    %53 = vector.broadcast %cst_23 : f32 to vector<10x18x128xf32>
    %54 = arith.select %52, %37, %53 : vector<10x18x128xi1>, vector<10x18x128xf32>
    %55 = vector.extract_strided_slice %54 {offsets = [0, 0, 0], sizes = [8, 16, 128], strides = [1, 1, 1]} : vector<10x18x128xf32> to vector<8x16x128xf32>
    %56 = vector.extract_strided_slice %54 {offsets = [0, 1, 0], sizes = [8, 16, 128], strides = [1, 1, 1]} : vector<10x18x128xf32> to vector<8x16x128xf32>
    %57 = vector.extract_strided_slice %54 {offsets = [0, 2, 0], sizes = [8, 16, 128], strides = [1, 1, 1]} : vector<10x18x128xf32> to vector<8x16x128xf32>
    %58 = vector.extract_strided_slice %54 {offsets = [1, 0, 0], sizes = [8, 16, 128], strides = [1, 1, 1]} : vector<10x18x128xf32> to vector<8x16x128xf32>
    %59 = vector.extract_strided_slice %54 {offsets = [1, 1, 0], sizes = [8, 16, 128], strides = [1, 1, 1]} : vector<10x18x128xf32> to vector<8x16x128xf32>
    %60 = vector.extract_strided_slice %54 {offsets = [1, 2, 0], sizes = [8, 16, 128], strides = [1, 1, 1]} : vector<10x18x128xf32> to vector<8x16x128xf32>
    %61 = vector.extract_strided_slice %54 {offsets = [2, 0, 0], sizes = [8, 16, 128], strides = [1, 1, 1]} : vector<10x18x128xf32> to vector<8x16x128xf32>
    %62 = vector.extract_strided_slice %54 {offsets = [2, 1, 0], sizes = [8, 16, 128], strides = [1, 1, 1]} : vector<10x18x128xf32> to vector<8x16x128xf32>
    %63 = vector.extract_strided_slice %54 {offsets = [2, 2, 0], sizes = [8, 16, 128], strides = [1, 1, 1]} : vector<10x18x128xf32> to vector<8x16x128xf32>
    %64 = tpu.concatenate %55, %56, %57, %58, %59, %60, %61, %62, %63 in 2 : vector<8x16x128xf32>, vector<8x16x128xf32>, vector<8x16x128xf32>, vector<8x16x128xf32>, vector<8x16x128xf32>, vector<8x16x128xf32>, vector<8x16x128xf32>, vector<8x16x128xf32>, vector<8x16x128xf32> -> vector<8x16x1152xf32>
    %65 = vector.shape_cast %64 : vector<8x16x1152xf32> to vector<128x1152xf32>
    %c0_24 = arith.constant 0 : index
    %c0_25 = arith.constant 0 : index
    %66 = vector.load %arg5[%c0_24, %c0_25] : memref<1152x128xf32, #tpu.memory_space<vmem>>, vector<1152x128xf32>
    %cst_26 = arith.constant dense<0.000000e+00> : vector<128x128xf32>
    %67 = tpu.matmul %65, %66, %cst_26 {dimension_numbers = #tpu.dot_dimension_numbers<[1], [0], [0], [1], [0, 0, 1, 1], [], []>} : vector<128x1152xf32>, vector<1152x128xf32>, vector<128x128xf32> -> vector<128x128xf32>
    %68 = vector.shape_cast %67 : vector<128x128xf32> to vector<1x8x16x128xf32>
    %c0_27 = arith.constant 0 : index
    %c0_28 = arith.constant 0 : index
    %c0_29 = arith.constant 0 : index
    %c0_30 = arith.constant 0 : index
    %69 = vector.load %arg6[%c0_27, %c0_28, %c0_29, %c0_30] : memref<1x8x16x128xf32, #tpu.memory_space<vmem>>, vector<1x8x16x128xf32>
    tpu.vector_store %arg6[%c0_27, %c0_28, %c0_29, %c0_30], %68 {strides = array<i32>} : memref<1x8x16x128xf32, #tpu.memory_space<vmem>>, vector<1x8x16x128xf32>,
    return
  }
  func.func @transform_1(%arg0: i32, %arg1: i32) -> (i32, i32) {
    %c0_i32 = arith.constant 0 : i32
    %c0_i32_0 = arith.constant 0 : i32
    %c0_i32_1 = arith.constant 0 : i32
    return %c0_i32, %c0_i32_0 : i32, i32
  }
  func.func @transform_2(%arg0: i32, %arg1: i32) -> (i32, i32) {
    %c0_i32 = arith.constant 0 : i32
    %c0_i32_0 = arith.constant 0 : i32
    %c0_i32_1 = arith.constant 0 : i32
    return %c0_i32, %c0_i32_0 : i32, i32
  }
  func.func @transform_3(%arg0: i32, %arg1: i32) -> (i32, i32) {
    %c0_i32 = arith.constant 0 : i32
    %c0_i32_0 = arith.constant 0 : i32
    %c0_i32_1 = arith.constant 0 : i32
    return %c0_i32, %c0_i32_0 : i32, i32
  }
  func.func @transform_4(%arg0: i32, %arg1: i32) -> (i32, i32, i32, i32) {
    %c0_i32 = arith.constant 0 : i32
    %c0_i32_0 = arith.constant 0 : i32
    %c0_i32_1 = arith.constant 0 : i32
    return %arg0, %arg1, %c0_i32, %c0_i32_0 : i32, i32, i32, i32
  }
}

</mosaic_0001>

<bundles_post_ra>
// kernel: tpu_custom_call.1
= control target key start
LH: loop header
LB: loop body
LE: loop exit
PB: predicated region body
PF: predicated region fallthrough
CT: control target
= control target key end

     0   :  { %9 = vsyncpa [#allocation5], 0  ;;  %s3808_s0 = inlined_call_operand.vmem [shape: f32[2,18,18,128], index: 0, kind: input, shape index: {}]   ;;  %s3809_s1 = inlined_call_operand.vmem [shape: f32[1,128], index: 1, kind: input, shape index: {}]   ;;  %s3810_s2 = inlined_call_operand.vmem [shape: f32[1,128], index: 2, kind: input, shape index: {}]   ;;  %s3811_s3 = inlined_call_operand.vmem [shape: f32[1152,128], index: 3, kind: input, shape index: {}]   ;;  %s3812_s4 = inlined_call_operand.hbm [shape: f32[2,16,16,128], index: 4, kind: output, shape index: {}]  }
   0x1   :  { %11 = vsyncpa [#allocation5 + $0x1], 0  ;;  %s2055_s15 = smov 0   ;;  %s2057_s16 = smov 0  }
   0x2   :  { %s2059_s17 = smov 0   ;;  %s2061_s18 = smov 0  }
   0x3   :  { %s2063_s19 = smov 0   ;;  %s2065_s20 = smov 0  }
   0x4   :  { %s2067_s21 = smov 0   ;;  %s2069_s22 = smov 0  }
   0x5 LB: > { %s1685_s23 = sadd.s32 4294967295, %s2026_s22   ;;  %s1686_s24 = sadd.s32 4294967294, %s2026_s22   ;;  %s2026_s22 = sphi %s2069_s22, %s17_s22   ;;  %s2022_s21 = sphi %s2067_s21, %s4077_s21   ;;  %s2018_s20 = sphi %s2065_s20, %s4076_s20   ;;  %s2014_s19 = sphi %s2063_s19, %s4075_s19   ;;  %s2010_s18 = sphi %s2061_s18, %s4074_s18   ;;  %s2006_s17 = sphi %s2059_s17, %s4073_s17   ;;  %s2002_s16 = sphi %s2057_s16, %s4072_s16   ;;  %s1998_s15 = sphi %s2055_s15, %s4071_s15  }
   0x6   : > { %s26_s25 = sadd.s32 1, %s2018_s20  ;;  %s29_s26 = sadd.s32 1, %s2022_s21 }
   0x7   : > { %p27_p0 = scmp.ge.s32.totalorder %s26_s25, 2  ;;  %p111_p1 = scmp.ne.s32.totalorder %s2006_s17, %s2002_s16 }
   0x8   : > { %p112_p2 = scmp.eq.s32.totalorder %s1685_s23, 3  ;;  %p117_p5 = scmp.ne.s32.totalorder %s2002_s16, %s1998_s15 }
   0x9   : > { %s4079_s25 = smov (%p27_p0, %s26_s25), 0  ;;  %s4081_s26 = smov (!%p27_p0, %s29_s26), %s2022_s21 }
   0xa   : > { %s97_s27 = ssub.s32 %s2018_s20, %s4079_s25  ;;  %p2106_p3 = por %p112_p2, %p111_p1 }
   0xb   : > { %p31_p4 = scmp.ge.s32.totalorder %s4081_s26, 2  ;;  %p118_p6 = scmp.eq.s32.totalorder %s1686_s24, 3 }
   0xc   : > { %p1688_p7 = scmp.ge.s32.totalorder %s2026_s22, 1  ;;  %p145_p9 = scmp.lt.s32.totalorder %s2026_s22, 5 }
   0xd   : > { %s4083_s26 = smov (%p31_p4, %s4081_s26), 0  ;;  %p2115_p8 = por %p118_p6, %p117_p5 }
   0xe   : > { %s96_s30 = ssub.s32 %s2022_s21, %s4083_s26  ;;  %s101_s5 = sadd.s32 1, %s2006_s17 }
   0xf   : > { %s98_s6 = sor.u32 %s97_s27, %s96_s30  ;;  %p146_p10 = pnand %p1688_p7, %p145_p9 }
  0x10   : > { %p99_p11 = scmp.eq.s32.totalorder %s98_s6, 0 }
  0x11   : > { %149 = sbr.rel (%p146_p10) target bundleno = 573 (0x23d), region = 32 }
  0x12   : > { %s2124_s7 = scalar_select %p99_p11, %s2006_s17, %s101_s5  }
  0x16   : > { %s3813_s8 = sand.u32 1, %s2002_s16   ;;  %p1691_p12 = scmp.ne.s32.totalorder %s2010_s18, 0 }
  0x17   : > { %s1689_s10 = sshll.u32 %s3813_s8, 7  ;;  %s1692_s12 = smul.u32 (!%p1691_p12), 192, %s2010_s18 }
  0x18   : > { %s2130_s11 = scalar_lea.vmem [#allocation4], %s1689_s10  ;;  %169 = sbr.rel (%p1691_p12) target bundleno = 61 (0x3d), region = 36 }
  0x19   : > { %s171_s13 = smul.u32 (!%p1691_p12), 432, %s2014_s19 }
  0x1b   : > { %s172_s14 = sadd.s32 (!%p1691_p12), %s1692_s12, %s171_s13 }
  0x1c   : > { %s2138_s27 = scalar_lea.vmem (!%p1691_p12), %s3808_s0, %s172_s14 }
  0x1d   : > { %v186_v0 = vld [vmem:[%s2138_s27] sm:$0xff]  ;;  %v188_v1 = vld [vmem:[%s2138_s27 + $0x8] sm:$0xff]  ;;  %v190_v2 = vld [vmem:[%s2138_s27 + $0x18] sm:$0xff] }
  0x1e   : > { %187 = vst [vmem:[#allocation2] sm:$0xff] %v186_v0  ;;  %v192_v3 = vld [vmem:[%s2138_s27 + $0x20] sm:$0xff]  ;;  %v194_v4 = vld [vmem:[%s2138_s27 + $0x30] sm:$0xff]  ;;  %v196_v5 = vld [vmem:[%s2138_s27 + $0x38] sm:$0xff] }
  0x1f   : > { %189 = vst [vmem:[#allocation2 + $0x8] sm:$0xff] %v188_v1  ;;  %v198_v6 = vld [vmem:[%s2138_s27 + $0x48] sm:$0xff]  ;;  %v200_v7 = vld [vmem:[%s2138_s27 + $0x50] sm:$0xff]  ;;  %v202_v8 = vld [vmem:[%s2138_s27 + $0x60] sm:$0xff] }
  0x20   : > { %191 = vst [vmem:[#allocation2 + $0x18] sm:$0xff] %v190_v2  ;;  %v204_v9 = vld [vmem:[%s2138_s27 + $0x68] sm:$0xff]  ;;  %v206_v10 = vld [vmem:[%s2138_s27 + $0x78] sm:$0xff]  ;;  %v208_v11 = vld [vmem:[%s2138_s27 + $0x80] sm:$0xff] }
  0x21   : > { %193 = vst [vmem:[#allocation2 + $0x20] sm:$0xff] %v192_v3  ;;  %v210_v12 = vld [vmem:[%s2138_s27 + $0x90] sm:$0xff]  ;;  %v212_v13 = vld [vmem:[%s2138_s27 + $0x98] sm:$0xff]  ;;  %v214_v14 = vld [vmem:[%s2138_s27 + $0xa8] sm:$0xff] }
  0x22   : > { %195 = vst [vmem:[#allocation2 + $0x30] sm:$0xff] %v194_v4  ;;  %v216_v15 = vld [vmem:[%s2138_s27 + $0xb0] sm:$0xff]  ;;  %v218_v16 = vld [vmem:[%s2138_s27 + $0xc0] sm:$0xff]  ;;  %v220_v17 = vld [vmem:[%s2138_s27 + $0xc8] sm:$0xff] }
  0x23   : > { %197 = vst [vmem:[#allocation2 + $0x38] sm:$0xff] %v196_v5  ;;  %v222_v18 = vld [vmem:[%s2138_s27 + $0xd8] sm:$0xff]  ;;  %v224_v19 = vld [vmem:[%s2138_s27 + $0xe0] sm:$0xff]  ;;  %v1693_v20 = vld [vmem:[%s2138_s27 + $0x10] sm:$0x3] }
  0x24   : > { %199 = vst [vmem:[#allocation2 + $0x48] sm:$0xff] %v198_v6  ;;  %v1694_v21 = vld [vmem:[%s2138_s27 + $0x28] sm:$0x3]  ;;  %v1695_v22 = vld [vmem:[%s2138_s27 + $0x40] sm:$0x3] }
  0x25   : > { %201 = vst [vmem:[#allocation2 + $0x50] sm:$0xff] %v200_v7  ;;  %v1696_v23 = vld [vmem:[%s2138_s27 + $0x58] sm:$0x3]  ;;  %v1697_v24 = vld [vmem:[%s2138_s27 + $0x70] sm:$0x3] }
  0x26   : > { %203 = vst [vmem:[#allocation2 + $0x60] sm:$0xff] %v202_v8  ;;  %v1698_v25 = vld [vmem:[%s2138_s27 + $0x88] sm:$0x3]  ;;  %v1699_v26 = vld [vmem:[%s2138_s27 + $0xa0] sm:$0x3] }
  0x27   : > { %205 = vst [vmem:[#allocation2 + $0x68] sm:$0xff] %v204_v9  ;;  %v1700_v27 = vld [vmem:[%s2138_s27 + $0xb8] sm:$0x3]  ;;  %v1701_v28 = vld [vmem:[%s2138_s27 + $0xd0] sm:$0x3] }
  0x28   : > { %207 = vst [vmem:[#allocation2 + $0x78] sm:$0xff] %v206_v10  ;;  %v1702_v29 = vld [vmem:[%s2138_s27 + $0xe8] sm:$0x3] }
  0x29   : > { %209 = vst [vmem:[#allocation2 + $0x80] sm:$0xff] %v208_v11 }
  0x2a   : > { %211 = vst [vmem:[#allocation2 + $0x90] sm:$0xff] %v210_v12 }
  0x2b   : > { %213 = vst [vmem:[#allocation2 + $0x98] sm:$0xff] %v212_v13 }
  0x2c   : > { %215 = vst [vmem:[#allocation2 + $0xa8] sm:$0xff] %v214_v14 }
  0x2d   : > { %217 = vst [vmem:[#allocation2 + $0xb0] sm:$0xff] %v216_v15 }
  0x2e   : > { %219 = vst [vmem:[#allocation2 + $0xc0] sm:$0xff] %v218_v16 }
  0x2f   : > { %221 = vst [vmem:[#allocation2 + $0xc8] sm:$0xff] %v220_v17 }
  0x30   : > { %223 = vst [vmem:[#allocation2 + $0xd8] sm:$0xff] %v222_v18 }
  0x31   : > { %225 = vst [vmem:[#allocation2 + $0xe0] sm:$0xff] %v224_v19 }
  0x32   : > { %237 = vst [vmem:[#allocation2 + $0x10] sm:$0x3] %v1693_v20 }
  0x33   : > { %239 = vst [vmem:[#allocation2 + $0x28] sm:$0x3] %v1694_v21 }
  0x34   : > { %241 = vst [vmem:[#allocation2 + $0x40] sm:$0x3] %v1695_v22 }
  0x35   : > { %243 = vst [vmem:[#allocation2 + $0x58] sm:$0x3] %v1696_v23 }
  0x36   : > { %245 = vst [vmem:[#allocation2 + $0x70] sm:$0x3] %v1697_v24 }
  0x37   : > { %247 = vst [vmem:[#allocation2 + $0x88] sm:$0x3] %v1698_v25 }
  0x38   : > { %249 = vst [vmem:[#allocation2 + $0xa0] sm:$0x3] %v1699_v26 }
  0x39   : > { %251 = vst [vmem:[#allocation2 + $0xb8] sm:$0x3] %v1700_v27 }
  0x3a   : > { %253 = vst [vmem:[#allocation2 + $0xd0] sm:$0x3] %v1701_v28 }
  0x3b   : > { %255 = vst [vmem:[#allocation2 + $0xe8] sm:$0x3] %v1702_v29 }
  0x3c   : > { %259 = vsyncadd [#allocation3], 2880 }
  0x3d PF: > { %p260_p13 = scmp.lt.s32.totalorder %s2010_s18, 0  ;;  %s261_s30 = ssub.s32 0, %s2010_s18 }
  0x3e   : > { %s1703_s5 = smin.u32 %s2010_s18, %s261_s30 }
  0x3f   : > { %s263_s6 = sand.u32 1, %s1703_s5  }
  0x40   : > { %s264_s10 = ssub.s32 0, %s263_s6 }
  0x41   : > { %s4085_s10 = smov (!%p260_p13, %s264_s10), %s263_s6 }
  0x42   : > { %p1705_p0 = scmp.lt.s32.totalorder %s4085_s10, 0  ;;  %s270_s12 = sadd.s32 2, %s4085_s10 }
  0x44   : > { %s4087_s12 = smov (!%p1705_p0, %s270_s12), %s4085_s10 }
  0x45   : > { %s272_s13 = smul.u32 240, %s4087_s12  ;;  %s274_s23 = scalar_lea.sflag [#allocation3], %s4087_s12 }
  0x47   : > { %s2176_s14 = scalar_lea.vmem [#allocation2], %s272_s13 }
  0x48   : > { %1990 = dma.done.wait %s274_s23, 2880 }
  0x49   : > { %1991 = vsyncadd %s274_s23, 4294964416  ;;  %s279_s24 = sadd.s32 1, %s2010_s18 }
  0x4a   : > { %p1706_p1 = scmp.ge.s32.totalorder %s279_s24, 2 }
  0x4b   : > { %s284_s27 = ssub.s32 (!%p1706_p1), 1, %s4087_s12  ;;  %s1623_s30 = smul.u32 (!%p1706_p1), 192, %s2010_s18 }
  0x4c   : > { %283 = sbr.rel (%p1706_p1) target bundleno = 113 (0x71), region = 62  ;;  %s292_s8 = scalar_lea.sflag (!%p1706_p1), [#allocation3], %s284_s27 }
  0x4d   : > { %s1624_s5 = smul.u32 (!%p1706_p1), 432, %s2014_s19 }
  0x4e   : > { %s290_s6 = smul.u32 (!%p1706_p1), 240, %s284_s27 }
  0x4f   : > { %s1625_s10 = sadd.s32 (!%p1706_p1), %s1624_s5, %s1623_s30 }
  0x50   : > { %s2188_s9 = scalar_lea.vmem (!%p1706_p1), %s3808_s0, %s1625_s10  ;;  %s2193_s23 = scalar_lea.vmem (!%p1706_p1), [#allocation2], %s290_s6 }
  0x51   : > { %v1707_v30 = vld [vmem:[%s2188_s9 + $0xc0] sm:$0xff]  ;;  %v1708_v31 = vld [vmem:[%s2188_s9 + $0xc8] sm:$0xff]  ;;  %v1709_v32 = vld [vmem:[%s2188_s9 + $0xd8] sm:$0xff] }
  0x52   : > { %306 = vst [vmem:[%s2193_s23] sm:$0xff] %v1707_v30  ;;  %v1710_v33 = vld [vmem:[%s2188_s9 + $0xe0] sm:$0xff]  ;;  %v1711_v34 = vld [vmem:[%s2188_s9 + $0xf0] sm:$0xff]  ;;  %v1712_v35 = vld [vmem:[%s2188_s9 + $0xf8] sm:$0xff] }
  0x53   : > { %308 = vst [vmem:[%s2193_s23 + $0x8] sm:$0xff] %v1708_v31  ;;  %v1713_v36 = vld [vmem:[%s2188_s9 + $0x108] sm:$0xff]  ;;  %v1714_v37 = vld [vmem:[%s2188_s9 + $0x110] sm:$0xff]  ;;  %v1715_v38 = vld [vmem:[%s2188_s9 + $0x120] sm:$0xff] }
  0x54   : > { %310 = vst [vmem:[%s2193_s23 + $0x18] sm:$0xff] %v1709_v32  ;;  %v1716_v39 = vld [vmem:[%s2188_s9 + $0x128] sm:$0xff]  ;;  %v1717_v40 = vld [vmem:[%s2188_s9 + $0x138] sm:$0xff]  ;;  %v1718_v41 = vld [vmem:[%s2188_s9 + $0x140] sm:$0xff] }
  0x55   : > { %312 = vst [vmem:[%s2193_s23 + $0x20] sm:$0xff] %v1710_v33  ;;  %v1719_v42 = vld [vmem:[%s2188_s9 + $0x150] sm:$0xff]  ;;  %v1720_v43 = vld [vmem:[%s2188_s9 + $0x158] sm:$0xff]  ;;  %v1721_v44 = vld [vmem:[%s2188_s9 + $0x168] sm:$0xff] }
  0x56   : > { %314 = vst [vmem:[%s2193_s23 + $0x30] sm:$0xff] %v1711_v34  ;;  %v1722_v45 = vld [vmem:[%s2188_s9 + $0x170] sm:$0xff]  ;;  %v1723_v46 = vld [vmem:[%s2188_s9 + $0x180] sm:$0xff]  ;;  %v1724_v47 = vld [vmem:[%s2188_s9 + $0x188] sm:$0xff] }
  0x57   : > { %316 = vst [vmem:[%s2193_s23 + $0x38] sm:$0xff] %v1712_v35  ;;  %v1725_v48 = vld [vmem:[%s2188_s9 + $0x198] sm:$0xff]  ;;  %v1726_v49 = vld [vmem:[%s2188_s9 + $0x1a0] sm:$0xff]  ;;  %v1727_v50 = vld [vmem:[%s2188_s9 + $0xd0] sm:$0x3] }
  0x58   : > { %318 = vst [vmem:[%s2193_s23 + $0x48] sm:$0xff] %v1713_v36  ;;  %v1729_v51 = vld [vmem:[%s2188_s9 + $0xe8] sm:$0x3]  ;;  %v1731_v52 = vld [vmem:[%s2188_s9 + $0x100] sm:$0x3] }
  0x59   : > { %320 = vst [vmem:[%s2193_s23 + $0x50] sm:$0xff] %v1714_v37  ;;  %v1733_v53 = vld [vmem:[%s2188_s9 + $0x118] sm:$0x3]  ;;  %v1735_v54 = vld [vmem:[%s2188_s9 + $0x130] sm:$0x3] }
  0x5a   : > { %322 = vst [vmem:[%s2193_s23 + $0x60] sm:$0xff] %v1715_v38  ;;  %v1737_v55 = vld [vmem:[%s2188_s9 + $0x148] sm:$0x3]  ;;  %v1739_v56 = vld [vmem:[%s2188_s9 + $0x160] sm:$0x3] }
  0x5b   : > { %324 = vst [vmem:[%s2193_s23 + $0x68] sm:$0xff] %v1716_v39  ;;  %v1741_v57 = vld [vmem:[%s2188_s9 + $0x178] sm:$0x3]  ;;  %v1743_v58 = vld [vmem:[%s2188_s9 + $0x190] sm:$0x3] }
  0x5c   : > { %326 = vst [vmem:[%s2193_s23 + $0x78] sm:$0xff] %v1717_v40  ;;  %v1745_v59 = vld [vmem:[%s2188_s9 + $0x1a8] sm:$0x3] }
  0x5d   : > { %328 = vst [vmem:[%s2193_s23 + $0x80] sm:$0xff] %v1718_v41 }
  0x5e   : > { %330 = vst [vmem:[%s2193_s23 + $0x90] sm:$0xff] %v1719_v42 }
  0x5f   : > { %332 = vst [vmem:[%s2193_s23 + $0x98] sm:$0xff] %v1720_v43 }
  0x60   : > { %334 = vst [vmem:[%s2193_s23 + $0xa8] sm:$0xff] %v1721_v44 }
  0x61   : > { %336 = vst [vmem:[%s2193_s23 + $0xb0] sm:$0xff] %v1722_v45 }
  0x62   : > { %338 = vst [vmem:[%s2193_s23 + $0xc0] sm:$0xff] %v1723_v46 }
  0x63   : > { %340 = vst [vmem:[%s2193_s23 + $0xc8] sm:$0xff] %v1724_v47 }
  0x64   : > { %342 = vst [vmem:[%s2193_s23 + $0xd8] sm:$0xff] %v1725_v48 }
  0x65   : > { %344 = vst [vmem:[%s2193_s23 + $0xe0] sm:$0xff] %v1726_v49 }
  0x66   : > { %1728 = vst [vmem:[%s2193_s23 + $0x10] sm:$0x3] %v1727_v50 }
  0x67   : > { %1730 = vst [vmem:[%s2193_s23 + $0x28] sm:$0x3] %v1729_v51 }
  0x68   : > { %1732 = vst [vmem:[%s2193_s23 + $0x40] sm:$0x3] %v1731_v52 }
  0x69   : > { %1734 = vst [vmem:[%s2193_s23 + $0x58] sm:$0x3] %v1733_v53 }
  0x6a   : > { %1736 = vst [vmem:[%s2193_s23 + $0x70] sm:$0x3] %v1735_v54 }
  0x6b   : > { %1738 = vst [vmem:[%s2193_s23 + $0x88] sm:$0x3] %v1737_v55 }
  0x6c   : > { %1740 = vst [vmem:[%s2193_s23 + $0xa0] sm:$0x3] %v1739_v56 }
  0x6d   : > { %1742 = vst [vmem:[%s2193_s23 + $0xb8] sm:$0x3] %v1741_v57 }
  0x6e   : > { %1744 = vst [vmem:[%s2193_s23 + $0xd0] sm:$0x3] %v1743_v58 }
  0x6f   : > { %1746 = vst [vmem:[%s2193_s23 + $0xe8] sm:$0x3] %v1745_v59 }
  0x70   : > { %378 = vsyncadd %s292_s8, 2880 }
  0x71 PF: > { %v827_v60 = vld [vmem:[%s3811_s3 + $0x78] sm:$0xff]  ;;  %v826_v61 = vld [vmem:[%s3811_s3 + $0x70] sm:$0xff]  ;;  %v507_v62 = vlaneseq  ;;  %s3874_s10 = sshll.u32 %s2010_s18, 3  ;;  %v825_v0 = vld [vmem:[%s3811_s3 + $0x68] sm:$0xff]  ;;  %v3880_v13 = vmov 0  ;;  %v3882_v19 = vmov 0 }
  0x72   : > { %v2262_v63 = vstv %s3874_s10  ;;  %1805 = vmatpush.msra.mxu1 %v827_v60  ;;  %1806 = vmatpush.msra.mxu2 %v827_v60  ;;  %v824_v3 = vld [vmem:[%s3811_s3 + $0x60] sm:$0xff]  ;;  %v823_v5 = vld [vmem:[%s3811_s3 + $0x58] sm:$0xff]  ;;  %v822_v7 = vld [vmem:[%s3811_s3 + $0x50] sm:$0xff]  ;;  %v3894_v51 = vmov 0  ;;  %s1798_s24 = sshll.u32 %s2014_s19, 5  ;;  %s1573_s10 = sshll.u32 %s2130_s11, 4  ;;  %s1574_s10 = int_to_ptr.vmem [resolvable:$true] %s1573_s10 }
  0x73   : > { %3875 = vst [vmem:[#allocation10_spill] sm:$0xff] %v2262_v63  ;;  %1807 = vmatpush.msra.mxu3 %v827_v60  ;;  %956 = vmatpush.msra.mxu0 %v827_v60  ;;  %v2267_v1 = vshrl.u32 %v507_v62, 7  ;;  %v2270_v2 = vadd.s32 2, %v2262_v63  ;;  %v2284_v6 = vadd.s32 4, %v2262_v63  ;;  %v821_v8 = vld [vmem:[%s3811_s3 + $0x48] sm:$0xff]  ;;  %v2305_v10 = vadd.s32 6, %v2262_v63 }
  0x74   : > { %1808 = vmatpush.msra.mxu1 %v826_v61  ;;  %1809 = vmatpush.msra.mxu2 %v826_v61  ;;  %v820_v11 = vld [vmem:[%s3811_s3 + $0x40] sm:$0xff]  ;;  %v819_v12 = vld [vmem:[%s3811_s3 + $0x38] sm:$0xff]  ;;  %v818_v14 = vld [vmem:[%s3811_s3 + $0x30] sm:$0xff]  ;;  %v2370_v27 = vadd.s32 3, %v2262_v63  ;;  %v2409_v40 = vadd.s32 5, %v2262_v63  ;;  %v2471_v56 = vadd.s32 7, %v2262_v63 }
  0x75   : > { %3876 = vst [vmem:[#allocation11_spill] sm:$0xff] %v2267_v1  ;;  %1810 = vmatpush.msra.mxu3 %v826_v61  ;;  %957 = vmatpush.msra.mxu0 %v826_v61  ;;  %v2276_v4 = vadd.s32 16, %v2267_v1  ;;  %vm3817_vm1 = vcmp.ge.s32.totalorder %v2270_v2, 1  ;;  %vm572_vm3 = vcmp.le.s32.totalorder %v2270_v2, 16  ;;  %vm3816_vm5 = vcmp.ge.s32.totalorder %v2284_v6, 1  ;;  %v817_v18 = vld [vmem:[%s3811_s3 + $0x28] sm:$0xff] }
  0x76   : > { %1811 = vmatpush.msra.mxu1 %v825_v0  ;;  %1812 = vmatpush.msra.mxu2 %v825_v0  ;;  %vm3823_vm7 = vcmp.le.s32.totalorder %v2284_v6, 16  ;;  %vm3814_vm9 = vcmp.ge.s32.totalorder %v2305_v10, 1  ;;  %v2331_v15 = vld [vmem:[%s3809_s1] ss:$0 sm:$0xff]  ;;  %vm3820_vm11 = vcmp.le.s32.totalorder %v2305_v10, 16  ;;  %vm3822_vm12 = vcmp.ge.s32.totalorder %v2267_v1, 1 }
  0x77   : > { %3877 = vst [vmem:[#allocation12_spill] sm:$0xff] %v2276_v4  ;;  %1813 = vmatpush.msra.mxu3 %v825_v0  ;;  %958 = vmatpush.msra.mxu0 %v825_v0  ;;  %vm3826_vm0 = vcmp.le.s32.totalorder %v2276_v4, 16  ;;  %v385_v16 = vld [vmem:[%s2176_s14 + $0x30] sm:$0xff]  ;;  %v391_v17 = vld [vmem:[%s2176_s14 + $0x60] sm:$0xff]  ;;  %vm546_vm14 = vmand %vm3822_vm12, %vm3817_vm1  ;;  %s4070_s12 = sand.u32 1, %s2002_s16  }
  0x78   : > { %1814 = vmatpush.msra.mxu1 %v824_v3  ;;  %1815 = vmatpush.msra.mxu2 %v824_v3  ;;  %vm548_vm2 = vmand %vm3826_vm0, %vm3817_vm1  ;;  %v397_v20 = vld [vmem:[%s2176_s14 + $0x90] sm:$0xff]  ;;  %v420_v22 = vmul.f32 %v2331_v15, %v385_v16  ;;  %v426_v24 = vmul.f32 %v2331_v15, %v391_v17  ;;  %v815_v25 = vld [vmem:[%s3811_s3 + $0x18] sm:$0xff]  ;;  %s1558_s27 = scalar_lea.sflag [#allocation5], %s4070_s12 }
  0x79   : > { %1816 = vmatpush.msra.mxu3 %v824_v3  ;;  %959 = vmatpush.msra.mxu0 %v824_v3  ;;  %vm2299_vm4 = vmand %vm548_vm2, %vm572_vm3  ;;  %v816_v21 = vld [vmem:[%s3811_s3 + $0x20] sm:$0xff]  ;;  %v432_v26 = vmul.f32 %v2331_v15, %v397_v20  ;;  %v814_v29 = vld [vmem:[%s3811_s3 + $0x10] sm:$0xff]  ;;  %v3900_v3 = vmov 0 }
  0x7a   : > { %1817 = vmatpush.msra.mxu1 %v823_v5  ;;  %1818 = vmatpush.msra.mxu2 %v823_v5  ;;  %vm554_vm6 = vmand %vm3826_vm0, %vm3816_vm5  ;;  %v2358_v23 = vld [vmem:[%s3810_s2] ss:$0 sm:$0xff]  ;;  %v392_v34 = vld [vmem:[%s2176_s14 + $0x68] sm:$0xff] }
  0x7b   : > { %1819 = vmatpush.msra.mxu3 %v823_v5  ;;  %960 = vmatpush.msra.mxu0 %v823_v5  ;;  %vm2320_vm8 = vmand %vm554_vm6, %vm3823_vm7  ;;  %v379_v28 = vld [vmem:[%s2176_s14] sm:$0xff]  ;;  %v453_v30 = vadd.f32 %v2358_v23, %v420_v22  ;;  %v459_v32 = vadd.f32 %v2358_v23, %v426_v24  ;;  %v813_v35 = vld [vmem:[%s3811_s3 + $0x8] sm:$0xff]  ;;  %v465_v36 = vadd.f32 %v2358_v23, %v432_v26  ;;  %v3909_v24 = vmov 0 }
  0x7c   : > { %1820 = vmatpush.msra.mxu1 %v822_v7  ;;  %1821 = vmatpush.msra.mxu2 %v822_v7  ;;  %v3881_v13 = vsel %vm2320_vm8, 4294967295, %v3880_v13  ;;  %vm560_vm10 = vmand %vm3826_vm0, %vm3814_vm9  ;;  %v386_v38 = vld [vmem:[%s2176_s14 + $0x38] sm:$0xff]  ;;  %v414_v39 = vmul.f32 %v2331_v15, %v379_v28  ;;  %v812_v41 = vld [vmem:[%s3811_s3] sm:$0xff]  ;;  %v427_v45 = vmul.f32 %v2331_v15, %v392_v34  ;;  %vm3954_vm8 = vcmp.ge.s32.totalorder %v2370_v27, 1 }
  0x7d   : > { %1822 = vmatpush.msra.mxu3 %v822_v7  ;;  %961 = vmatpush.msra.mxu0 %v822_v7  ;;  %vm2346_vm13 = vmand %vm560_vm10, %vm3820_vm11  ;;  %vm3815_vm10 = vcmp.ge.s32.totalorder %v2370_v27, 1  ;;  %v2418_v42 = vmax.f32 %v453_v30, 0.0  ;;  %v2420_v43 = vmax.f32 %v459_v32, 0.0  ;;  %v398_v46 = vld [vmem:[%s2176_s14 + $0x98] sm:$0xff]  ;;  %v421_v47 = vmul.f32 %v2331_v15, %v386_v38  ;;  %v858_v57 = vld [vmem:[%s3811_s3 + $0x170] sm:$0xff] }
  0x7e   : > { %1823 = vmatpush.msra.mxu1 %v821_v8  ;;  %1824 = vmatpush.msra.mxu2 %v821_v8  ;;  %v3883_v19 = vsel %vm2346_vm13, 4294967295, %v3882_v19  ;;  %vm2379_vm15 = vmand %vm546_vm14, %vm572_vm3  ;;  %v859_v49 = vld [vmem:[%s3811_s3 + $0x178] sm:$0xff]  ;;  %v2444_v50 = vmax.f32 %v465_v36, 0.0  ;;  %v2455_v52 = vadd.f32 %v2358_v23, %v414_v39  ;;  %v433_v54 = vmul.f32 %v2331_v15, %v398_v46  ;;  %v842_v61 = vld [vmem:[%s3811_s3 + $0xf0] sm:$0xff] }
  0x7f   : > { %1825 = vmatpush.msra.mxu3 %v821_v8  ;;  %962 = vmatpush.msra.mxu0 %v821_v8  ;;  %vm2388_vm2 = vmand %vm3822_vm12, %vm3816_vm5  ;;  %vm3821_vm5 = vcmp.ge.s32.totalorder %v2262_v63, 1  ;;  %v843_v53 = vld [vmem:[%s3811_s3 + $0xf8] sm:$0xff]  ;;  %v460_v59 = vadd.f32 %v2358_v23, %v427_v45  ;;  %v857_v62 = vld [vmem:[%s3811_s3 + $0x168] sm:$0xff]  ;;  %v454_v0 = vadd.f32 %v2358_v23, %v421_v47  ;;  %v3911_v30 = vmov 0 }
  0x80   : > { %1826 = vmatpush.msra.mxu1 %v820_v11  ;;  %1827 = vmatpush.msra.mxu2 %v820_v11  ;;  %vm2401_vm6 = vmand %vm3822_vm12, %vm3814_vm9  ;;  %v875_v58 = vld [vmem:[%s3811_s3 + $0x1f8] sm:$0xff]  ;;  %v874_v5 = vld [vmem:[%s3811_s3 + $0x1f0] sm:$0xff]  ;;  %v477_v8 = vmax.f32 %v2455_v52, 0.0  ;;  %vm3930_vm13 = vcmp.le.s32.totalorder %v2409_v40, 16 }
  0x81   : > { %1828 = vmatpush.msra.mxu3 %v820_v11  ;;  %963 = vmatpush.msra.mxu0 %v820_v11  ;;  %vm551_vm14 = vmand %vm3826_vm0, %vm3815_vm10  ;;  %vm3818_vm10 = vcmp.le.s32.totalorder %v2370_v27, 16  ;;  %v394_v11 = vld [vmem:[%s2176_s14 + $0x78] sm:$0xff]  ;;  %v388_v16 = vld [vmem:[%s2176_s14 + $0x48] sm:$0xff]  ;;  %v2547_v20 = vmax.f32 %v460_v59, 0.0  ;;  %v2556_v22 = vmax.f32 %v454_v0, 0.0 }
  0x82   : > { %1829 = vmatpush.msra.mxu1 %v819_v12  ;;  %1830 = vmatpush.msra.mxu2 %v819_v12  ;;  %vm2426_vm9 = vmand %vm2388_vm2, %vm3823_vm7  ;;  %v856_v17 = vld [vmem:[%s3811_s3 + $0x160] sm:$0xff]  ;;  %v380_v26 = vld [vmem:[%s2176_s14 + $0x8] sm:$0xff] }
  0x83   : > { %1831 = vmatpush.msra.mxu3 %v819_v12  ;;  %964 = vmatpush.msra.mxu0 %v819_v12  ;;  %vm2437_vm1 = vmand %vm551_vm14, %vm3818_vm10  ;;  %vm3819_vm14 = vcmp.ge.s32.totalorder %v2409_v40, 1  ;;  %v841_v12 = vld [vmem:[%s3811_s3 + $0xe8] sm:$0xff]  ;;  %v855_v28 = vld [vmem:[%s3811_s3 + $0x158] sm:$0xff]  ;;  %v415_v37 = vmul.f32 %v2331_v15, %v380_v26 }
  0x84   : > { %1832 = vmatpush.msra.mxu1 %v818_v14  ;;  %1833 = vmatpush.msra.mxu2 %v818_v14  ;;  %vm2450_vm2 = vmand %vm2401_vm6, %vm3820_vm11  ;;  %vm3825_vm11 = vcmp.le.s32.totalorder %v2409_v40, 16  ;;  %v872_v32 = vld [vmem:[%s3811_s3 + $0x1e0] sm:$0xff]  ;;  %v839_v33 = vld [vmem:[%s3811_s3 + $0xd8] sm:$0xff] }
  0x85   : > { %1834 = vmatpush.msra.mxu3 %v818_v14  ;;  %965 = vmatpush.msra.mxu0 %v818_v14  ;;  %v3895_v51 = vsel %vm2450_vm2, 4294967295, %v3894_v51  ;;  %vm2466_vm6 = vmand %vm3826_vm0, %vm3819_vm14  ;;  %vm3824_vm14 = vcmp.le.s32.totalorder %v2262_v63, 16  ;;  %v854_v36 = vld [vmem:[%s3811_s3 + $0x150] sm:$0xff]  ;;  %v871_v38 = vld [vmem:[%s3811_s3 + $0x1d8] sm:$0xff]  ;;  %v2660_v60 = vadd.f32 %v2358_v23, %v415_v37 }
  0x86   : > { %1835 = vmatpush.msra.mxu1 %v817_v18  ;;  %1836 = vmatpush.msra.mxu2 %v817_v18  ;;  %vm2490_vm10 = vmand %vm3822_vm12, %vm3821_vm5  ;;  %vm3902_vm12 = vcmp.ge.s32.totalorder %v2270_v2, 1  ;;  %v466_v2 = vadd.f32 %v2358_v23, %v433_v54  ;;  %v838_v39 = vld [vmem:[%s3811_s3 + $0xd0] sm:$0xff]  ;;  %v853_v46 = vld [vmem:[%s3811_s3 + $0x148] sm:$0xff] }
  0x87   : > { %1837 = vmatpush.msra.mxu3 %v817_v18  ;;  %966 = vmatpush.msra.mxu0 %v817_v18  ;;  %vm2507_vm5 = vmand %vm2466_vm6, %vm3825_vm11  ;;  %v873_v18 = vld [vmem:[%s3811_s3 + $0x1e8] sm:$0xff]  ;;  %v870_v47 = vld [vmem:[%s3811_s3 + $0x1d0] sm:$0xff] }
  0x88   : > { %1838 = vmatpush.msra.mxu1 %v816_v21  ;;  %1839 = vmatpush.msra.mxu2 %v816_v21  ;;  %v3901_v3 = vsel %vm2507_vm5, 4294967295, %v3900_v3  ;;  %vm2521_vm7 = vmand %vm3902_vm12, %vm572_vm3  ;;  %vm3828_vm3 = vcmp.ge.s32.totalorder %v2471_v56, 1  ;;  %v2590_v34 = vmax.f32 %v466_v2, 0.0  ;;  %v890_v54 = vld [vmem:[%s3811_s3 + $0x270] sm:$0xff]  ;;  %v837_v55 = vld [vmem:[%s3811_s3 + $0xc8] sm:$0xff] }
  0x89   : > { %1840 = vmatpush.msra.mxu3 %v816_v21  ;;  %967 = vmatpush.msra.mxu0 %v816_v21  ;;  %vm2534_vm6 = vmand %vm2490_vm10, %vm3824_vm14  ;;  %v840_v21 = vld [vmem:[%s3811_s3 + $0xe0] sm:$0xff]  ;;  %vm3907_vm10 = vcmp.le.s32.totalorder %v2284_v6, 16  ;;  %vm3908_vm14 = vcmp.ge.s32.totalorder %v2284_v6, 1  ;;  %v423_v6 = vmul.f32 %v2331_v15, %v388_v16  ;;  %v869_v59 = vld [vmem:[%s3811_s3 + $0x1c8] sm:$0xff] }
  0x8a   : > { %1841 = vmatpush.msra.mxu1 %v815_v25  ;;  %1842 = vmatpush.msra.mxu2 %v815_v25  ;;  %vm563_vm12 = vmand %vm3826_vm0, %vm3828_vm3  ;;  %vm3827_vm0 = vcmp.le.s32.totalorder %v2471_v56, 16  ;;  %3913 = vst [vmem:[#allocation13_spill] sm:$0xff] %v2590_v34  ;;  %v836_v2 = vld [vmem:[%s3811_s3 + $0xc0] sm:$0xff]  ;;  %v382_v26 = vld [vmem:[%s2176_s14 + $0x18] sm:$0xff] }
  0x8b   : > { %1843 = vmatpush.msra.mxu3 %v815_v25  ;;  %968 = vmatpush.msra.mxu0 %v815_v25  ;;  %vm2562_vm11 = vmand %vm3908_vm14, %vm3907_vm10  ;;  %v429_v25 = vmul.f32 %v2331_v15, %v394_v11  ;;  %vm3915_vm10 = vcmp.ge.s32.totalorder %v2305_v10, 1  ;;  %v846_v37 = vld [vmem:[%s3811_s3 + $0x110] sm:$0xff]  ;;  %v877_v52 = vld [vmem:[%s3811_s3 + $0x208] sm:$0xff] }
  0x8c   : > { %1844 = vmatpush.msra.mxu1 %v814_v29  ;;  %1845 = vmatpush.msra.mxu2 %v814_v29  ;;  %v3910_v24 = vsel %vm2562_vm11, 4294967295, %v3909_v24  ;;  %vm2580_vm14 = vmand %vm563_vm12, %vm3827_vm0  ;;  %vm3914_vm12 = vcmp.le.s32.totalorder %v2305_v10, 16  ;;  %v891_v10 = vld [vmem:[%s3811_s3 + $0x278] sm:$0xff]  ;;  %v949_v9 = vld [vmem:[%s3811_s3 + $0x448] sm:$0xff] }
  0x8d   : > { %1846 = vmatpush.msra.mxu3 %v814_v29  ;;  %969 = vmatpush.msra.mxu0 %v814_v29  ;;  %v400_v29 = vld [vmem:[%s2176_s14 + $0xa8] sm:$0xff]  ;;  %v3912_v30 = vsel %vm2580_vm14, 4294967295, %v3911_v30  ;;  %vm2599_vm0 = vmand %vm3915_vm10, %vm3914_vm12  ;;  %vm3919_vm12 = vcmp.ge.s32.totalorder %v2370_v27, 1  ;;  %vm3920_vm10 = vcmp.ge.s32.totalorder %v2267_v1, 1  ;;  %vm3923_vm14 = vcmp.ge.s32.totalorder %v2409_v40, 1 }
  0x8e   : > { %1847 = vmatpush.msra.mxu1 %v813_v35  ;;  %1848 = vmatpush.msra.mxu2 %v813_v35  ;;  %v435_v45 = vmul.f32 %v2331_v15, %v400_v29  ;;  %vm2632_vm3 = vmand %vm3920_vm10, %vm3919_vm12  ;;  %v478_v29 = vmax.f32 %v2660_v60, 0.0  ;;  %v886_v60 = vld [vmem:[%s3811_s3 + $0x250] sm:$0xff]  ;;  %v947_v48 = vld [vmem:[%s3811_s3 + $0x438] sm:$0xff] }
  0x8f   : > { %1849 = vmatpush.msra.mxu3 %v813_v35  ;;  %970 = vmatpush.msra.mxu0 %v813_v35  ;;  %v3916_v35 = vmov 0  ;;  %vm3924_vm12 = vmmov %vm3920_vm10 }
  0x90   : > { %1850 = vmatpush.msra.mxu1 %v812_v41  ;;  %1851 = vmatpush.msra.mxu2 %v812_v41  ;;  %v3917_v35 = vsel %vm2599_vm0, 4294967295, %v3916_v35  ;;  %vm2649_vm10 = vmand %vm3924_vm12, %vm3923_vm14  ;;  %vm3927_vm14 = vcmp.le.s32.totalorder %v2370_v27, 16  ;;  %v468_v11 = vadd.f32 %v2358_v23, %v435_v45  ;;  %v417_v45 = vmul.f32 %v2331_v15, %v382_v26 }
  0x91   : > { %1751 = vmatmul.msk.f32.vlgmr.msra.gmra.mxu1 %vm2379_vm15, %v2418_v42  ;;  %1755 = vmatmul.msk.f32.vlgmr.msra.gmra.mxu2 %vm2426_vm9, %v2420_v43  ;;  %3918 = vst [vmem:[#allocation14_spill] sm:$0xff] %v3917_v35  ;;  %vm2670_vm12 = vmand %vm2632_vm3, %vm3927_vm14  ;;  %vm3933_vm14 = vcmp.ge.s32.totalorder %v2471_v56, 1 }
  0x92   : > { %1086 = vmatpush.msrb.mxu2 %v859_v49  ;;  %1852 = vmatpush.msra.mxu3 %v812_v41  ;;  %v456_v49 = vadd.f32 %v2358_v23, %v423_v6  ;;  %vm2687_vm3 = vmand %vm2649_vm10, %vm3930_vm13  ;;  %v888_v6 = vld [vmem:[%s3811_s3 + $0x260] sm:$0xff]  ;;  %vm3938_vm13 = vcmp.ge.s32.totalorder %v2262_v63, 1 }
  0x93   : > { %1021 = vmatpush.msrb.mxu1 %v843_v53  ;;  %1759 = vmatmul.msk.f32.vlgmr.msra.gmra.mxu3 %vm2450_vm2, %v2444_v50 }
  0x94   : > { %1087 = vmatpush.msrb.mxu2 %v858_v57  ;;  %1151 = vmatpush.msrb.mxu3 %v875_v58  ;;  %v852_v58 = vld [vmem:[%s3811_s3 + $0x140] sm:$0xff]  ;;  %v2681_v16 = vmax.f32 %v456_v49, 0.0 }
  0x95   : > { %1022 = vmatpush.msrb.mxu1 %v842_v61  ;;  %971 = vmatpush.msra.mxu0 %v812_v41  ;;  %v462_v41 = vadd.f32 %v2358_v23, %v429_v25  ;;  %v395_v61 = vld [vmem:[%s2176_s14 + $0x80] sm:$0xff] }
  0x96   : > { %1088 = vmatpush.msrb.mxu2 %v857_v62  ;;  %1152 = vmatpush.msrb.mxu3 %v874_v5  ;;  %v889_v62 = vld [vmem:[%s3811_s3 + $0x268] sm:$0xff]  ;;  %v430_v25 = vmul.f32 %v2331_v15, %v395_v61 }
  0x97   : > { %1023 = vmatpush.msrb.mxu1 %v841_v12  ;;  %1747 = vmatmul.msk.f32.vlgmr.msra.gmra.mxu0 %vm2534_vm6, %v477_v8  ;;  %v2674_v5 = vmax.f32 %v462_v41, 0.0  ;;  %v389_v12 = vld [vmem:[%s2176_s14 + $0x50] sm:$0xff]  ;;  %v833_v61 = vld [vmem:[%s3811_s3 + $0xa8] sm:$0xff] }
  0x98   : > { %1089 = vmatpush.msrb.mxu2 %v856_v17  ;;  %1153 = vmatpush.msrb.mxu3 %v873_v18  ;;  %v3931_v17 = vmov 0  ;;  %v851_v18 = vld [vmem:[%s3811_s3 + $0x138] sm:$0xff]  ;;  %v850_v41 = vld [vmem:[%s3811_s3 + $0x130] sm:$0xff]  ;;  %v463_v49 = vadd.f32 %v2358_v23, %v430_v25 }
  0x99   : > { %1024 = vmatpush.msrb.mxu1 %v840_v21  ;;  %1756 = vmatmul.msk.f32.gmra.mxu2 %vm2562_vm11, %v2547_v20  ;;  %v3932_v17 = vsel %vm2687_vm3, 4294967295, %v3931_v17 }
  0x9a   : > { %1752 = vmatmul.msk.f32.gmra.mxu1 %vm2521_vm7, %v2556_v22  ;;  %1090 = vmatpush.msrb.mxu2 %v855_v28  ;;  %v868_v28 = vld [vmem:[%s3811_s3 + $0x1c0] sm:$0xff] }
  0x9b   : > { %1154 = vmatpush.msrb.mxu3 %v872_v32  ;;  %1025 = vmatpush.msrb.mxu1 %v839_v33  ;;  %v424_v32 = vmul.f32 %v2331_v15, %v389_v12  ;;  %v401_v33 = vld [vmem:[%s2176_s14 + $0xb0] sm:$0xff]  ;;  %v865_v12 = vld [vmem:[%s3811_s3 + $0x1a8] sm:$0xff] }
  0x9c   : > { %1760 = vmatmul.msk.f32.gmra.mxu3 %vm2599_vm0, %v2590_v34  ;;  %1091 = vmatpush.msrb.mxu2 %v854_v36  ;;  %vm3934_vm0 = vcmp.ge.s32.totalorder %v2267_v1, 1  ;;  %v835_v36 = vld [vmem:[%s3811_s3 + $0xb8] sm:$0xff]  ;;  %v436_v53 = vmul.f32 %v2331_v15, %v401_v33 }
  0x9d   : > { %1155 = vmatpush.msrb.mxu3 %v871_v38  ;;  %1216 = vmatpush.msrb.mxu0 %v891_v10  ;;  %vm2698_vm2 = vmand %vm3934_vm0, %vm3933_vm14  ;;  %vm3937_vm0 = vcmp.le.s32.totalorder %v2262_v63, 16  ;;  %v2727_v38 = vmax.f32 %v468_v11, 0.0  ;;  %v2730_v10 = vadd.s32 1, %v2262_v63  ;;  %vm3942_vm14 = vcmp.le.s32.totalorder %v2471_v56, 16  ;;  %v847_v33 = vld [vmem:[%s3811_s3 + $0x118] sm:$0xff] }
  0x9e   : > { %1026 = vmatpush.msrb.mxu1 %v838_v39  ;;  %1092 = vmatpush.msrb.mxu2 %v853_v46  ;;  %vm2723_vm10 = vmand %vm3938_vm13, %vm3937_vm0  ;;  %v3943_v39 = vmov 0  ;;  %v867_v46 = vld [vmem:[%s3811_s3 + $0x1b8] sm:$0xff]  ;;  %v457_v57 = vadd.f32 %v2358_v23, %v424_v32  ;;  %v450_v11 = vadd.f32 %v2358_v23, %v417_v45  ;;  %vm3946_vm0 = vcmp.le.s32.totalorder %v2409_v40, 16  ;;  %v884_v45 = vld [vmem:[%s3811_s3 + $0x240] sm:$0xff] }
  0x9f   : > { %1156 = vmatpush.msrb.mxu3 %v870_v47  ;;  %1217 = vmatpush.msrb.mxu0 %v890_v54  ;;  %3941 = vst [vmem:[#allocation15_spill] sm:$0xff] %v2727_v38  ;;  %vm2739_vm5 = vmand %vm2698_vm2, %vm3942_vm14  ;;  %v887_v47 = vld [vmem:[%s3811_s3 + $0x258] sm:$0xff]  ;;  %v834_v54 = vld [vmem:[%s3811_s3 + $0xb0] sm:$0xff]  ;;  %vm3839_vm2 = vcmp.ge.s32.totalorder %v2730_v10, 1  ;;  %vm3947_vm13 = vcmp.ge.s32.totalorder %v2409_v40, 1  ;;  %v469_v25 = vadd.f32 %v2358_v23, %v436_v53 }
  0xa0   : > { %1027 = vmatpush.msrb.mxu1 %v837_v55  ;;  %1093 = vmatpush.msrb.mxu2 %v852_v58  ;;  %v3944_v39 = vsel %vm2739_vm5, 4294967295, %v3943_v39  ;;  %v849_v55 = vld [vmem:[%s3811_s3 + $0x128] sm:$0xff]  ;;  %v381_v58 = vld [vmem:[%s2176_s14 + $0x10] sm:$0x3]  ;;  %vm2794_vm14 = vmand %vm3947_vm13, %vm3946_vm0  ;;  %vm571_vm13 = vcmp.le.s32.totalorder %v2730_v10, 16 }
  0xa1   : > { %1157 = vmatpush.msrb.mxu3 %v869_v59  ;;  %1218 = vmatpush.msrb.mxu0 %v889_v62  ;;  %3945 = vst [vmem:[#allocation16_spill] sm:$0xff] %v3944_v39  ;;  %v866_v59 = vld [vmem:[%s3811_s3 + $0x1b0] sm:$0xff]  ;;  %v848_v62 = vld [vmem:[%s3811_s3 + $0x120] sm:$0xff]  ;;  %v416_v26 = vmul.f32 %v2331_v15, %v381_v58 }
  0xa2   : > { %1028 = vmatpush.msrb.mxu1 %v836_v2  ;;  %1757 = vmatmul.msk.f32.gmra.mxu2 %vm2687_vm3, %v2674_v5  ;;  %v885_v2 = vld [vmem:[%s3811_s3 + $0x248] sm:$0xff]  ;;  %vm3953_vm3 = vcmp.le.s32.totalorder %v2370_v27, 16  ;;  %v2832_v27 = vmax.f32 %v450_v11, 0.0  ;;  %v862_v11 = vld [vmem:[%s3811_s3 + $0x190] sm:$0xff]  ;;  %v844_v40 = vld [vmem:[%s3811_s3 + $0x100] sm:$0xff] }
  0xa3   : > { %1753 = vmatmul.msk.f32.gmra.mxu1 %vm2670_vm12, %v2681_v16  ;;  %1094 = vmatpush.msrb.mxu2 %v851_v18  ;;  %v2788_v18 = vmax.f32 %v463_v49, 0.0  ;;  %vm2818_vm11 = vmand %vm3954_vm8, %vm3953_vm3  ;;  %v831_v49 = vld [vmem:[%s3811_s3 + $0x98] sm:$0xff]  ;;  %v449_v14 = vadd.f32 %v2358_v23, %v416_v26  ;;  %vm3959_vm8 = vcmp.le.s32.totalorder %v2471_v56, 16 }
  0xa4   : > { %1158 = vmatpush.msrb.mxu3 %v868_v28  ;;  %1219 = vmatpush.msrb.mxu0 %v888_v6  ;;  %v832_v28 = vld [vmem:[%s3811_s3 + $0xa0] sm:$0xff]  ;;  %v2803_v6 = vmax.f32 %v457_v57, 0.0 }
  0xa5   : > { %1029 = vmatpush.msrb.mxu1 %v835_v36  ;;  %1748 = vmatmul.msk.f32.gmra.mxu0 %vm2723_vm10, %v478_v29  ;;  %v383_v36 = vld [vmem:[%s2176_s14 + $0x20] sm:$0xff] }
  0xa6   : > { %1761 = vmatmul.msk.f32.gmra.mxu3 %vm2739_vm5, %v2727_v38  ;;  %1095 = vmatpush.msrb.mxu2 %v850_v41  ;;  %vm3950_vm5 = vcmp.ge.s32.totalorder %v2267_v1, 1  ;;  %v864_v41 = vld [vmem:[%s3811_s3 + $0x1a0] sm:$0xff]  ;;  %v418_v53 = vmul.f32 %v2331_v15, %v383_v36  ;;  %v861_v36 = vld [vmem:[%s3811_s3 + $0x188] sm:$0xff] }
  0xa7   : > { %1159 = vmatpush.msrb.mxu3 %v867_v46  ;;  %1220 = vmatpush.msrb.mxu0 %v887_v47  ;;  %vm2809_vm0 = vmand %vm3950_vm5, %vm3839_vm2  ;;  %v610_v46 = vsel %vm2534_vm6, %v477_v8, 0.0  ;;  %v2840_v47 = vsel %vm2723_vm10, %v478_v29, 0.0  ;;  %v2856_v8 = vmax.f32 %v469_v25, 0.0  ;;  %vm3960_vm6 = vcmp.ge.s32.totalorder %v2471_v56, 1  ;;  %v863_v56 = vld [vmem:[%s3811_s3 + $0x198] sm:$0xff] }
  0xa8   : > { %1030 = vmatpush.msrb.mxu1 %v834_v54  ;;  %1096 = vmatpush.msrb.mxu2 %v849_v55  ;;  %vm2852_vm5 = vmand %vm2809_vm0, %vm571_vm13  ;;  %v3961_v29 = vmov 0  ;;  %vm3963_vm10 = vcmp.ge.s32.totalorder %v2262_v63, 1  ;;  %vm3964_vm0 = vcmp.le.s32.totalorder %v2276_v4, 16  ;;  %v883_v55 = vld [vmem:[%s3811_s3 + $0x238] sm:$0xff]  ;;  %v665_v57 = vrot.slane %v610_v46, 1  ;;  %v880_v54 = vld [vmem:[%s3811_s3 + $0x220] sm:$0xff] }
  0xa9   : > { %1160 = vmatpush.msrb.mxu3 %v866_v59  ;;  %1221 = vmatpush.msrb.mxu0 %v886_v60  ;;  %vm2866_vm3 = vmand %vm3960_vm6, %vm3959_vm8  ;;  %v722_v58 = vrot.slane %v610_v46, 2  ;;  %v666_v59 = vrot.slane %v2840_v47, 1  ;;  %v723_v60 = vrot.slane %v2840_v47, 2  ;;  %vm3853_vm8 = vcmask 1045504   ;;  %v384_v25 = vld [vmem:[%s2176_s14 + $0x28] sm:$0x3] }
  0xaa   : > { %1031 = vmatpush.msrb.mxu1 %v833_v61  ;;  %1097 = vmatpush.msrb.mxu2 %v848_v62  ;;  %v3962_v29 = vsel %vm2866_vm3, 4294967295, %v3961_v29  ;;  %vm2878_vm2 = vmand %vm3964_vm0, %vm3963_vm10  ;;  %v830_v61 = vld [vmem:[%s3811_s3 + $0x90] sm:$0xff]  ;;  %v845_v62 = vld [vmem:[%s3811_s3 + $0x108] sm:$0xff]  ;;  %vm3967_vm6 = vcmp.le.s32.totalorder %v2262_v63, 16  ;;  %vm3840_vm0 = vcmask 1046528  }
  0xab   : > { %1161 = vmatpush.msrb.mxu3 %v865_v12  ;;  %1222 = vmatpush.msrb.mxu0 %v885_v2  ;;  %v882_v12 = vld [vmem:[%s3811_s3 + $0x230] sm:$0xff]  ;;  %v479_v2 = vmax.f32 %v449_v14, 0.0  ;;  %vm2913_vm10 = vmand %vm2878_vm2, %vm3967_vm6  ;;  %v724_v46 = vsel %vm3853_vm8, %v722_v58, %v723_v60  ;;  %v667_v14 = vsel %vm3840_vm0, %v665_v57, %v666_v59  ;;  %vm3970_vm2 = vcmp.ge.s32.totalorder %v2730_v10, 1  ;;  %v876_v10 = vld [vmem:[%s3811_s3 + $0x200] sm:$0xff] }
  0xac   : > { %1032 = vmatpush.msrb.mxu1 %v832_v28  ;;  %1758 = vmatmul.msk.f32.gmra.mxu2 %vm2794_vm14, %v2788_v18  ;;  %v829_v28 = vld [vmem:[%s3811_s3 + $0x88] sm:$0xff]  ;;  %vm2955_vm6 = vmand %vm3970_vm2, %vm571_vm13  ;;  %v2962_v58 = vsel %vm2852_vm5, %v2832_v27, 0.0 }
  0xad   : > { %1754 = vmatmul.msk.f32.gmra.mxu1 %vm2818_vm11, %v2803_v6  ;;  %1098 = vmatpush.msrb.mxu2 %v847_v33  ;;  %v451_v33 = vadd.f32 %v2358_v23, %v418_v53  ;;  %v612_v53 = vsel %vm2913_vm10, %v479_v2, 0.0  ;;  %vm3973_vm10 = vmmov %vm3970_vm2  ;;  %vm3974_vm2 = vcmp.le.s32.totalorder %v2276_v4, 16 }
  0xae   : > { %1162 = vmatpush.msrb.mxu3 %v864_v41  ;;  %1223 = vmatpush.msrb.mxu0 %v884_v45  ;;  %v881_v41 = vld [vmem:[%s3811_s3 + $0x228] sm:$0xff]  ;;  %v828_v45 = vld [vmem:[%s3811_s3 + $0x80] sm:$0xff]  ;;  %v668_v26 = vrot.slane %v612_v53, 1  ;;  %vm2985_vm0 = vmand %vm3974_vm2, %vm3973_vm10  ;;  %vm3979_vm10 = vcmask 1046528  }
  0xaf   : > { %1033 = vmatpush.msrb.mxu1 %v831_v49  ;;  %1749 = vmatmul.msk.f32.gmra.mxu0 %vm2852_vm5, %v2832_v27  ;;  %v419_v49 = vmul.f32 %v2331_v15, %v384_v25  ;;  %v907_v25 = vld [vmem:[%s3811_s3 + $0x2f8] sm:$0xff] }
  0xb0   : > { %1762 = vmatmul.msk.f32.gmra.mxu3 %vm2866_vm3, %v2856_v8  ;;  %1099 = vmatpush.msrb.mxu2 %v846_v37  ;;  %v860_v37 = vld [vmem:[%s3811_s3 + $0x180] sm:$0xff] }
  0xb1   : > { %1163 = vmatpush.msrb.mxu3 %v863_v56  ;;  %1224 = vmatpush.msrb.mxu0 %v883_v55  ;;  %v923_v56 = vld [vmem:[%s3811_s3 + $0x378] sm:$0xff]  ;;  %v481_v55 = vmax.f32 %v451_v33, 0.0  ;;  %v452_v2 = vadd.f32 %v2358_v23, %v419_v49  ;;  %v878_v33 = vld [vmem:[%s3811_s3 + $0x210] sm:$0xff] }
  0xb2   : > { %1034 = vmatpush.msrb.mxu1 %v830_v61  ;;  %1100 = vmatpush.msrb.mxu2 %v845_v62  ;;  %v879_v62 = vld [vmem:[%s3811_s3 + $0x218] sm:$0xff] }
  0xb3   : > { %1164 = vmatpush.msrb.mxu3 %v862_v11  ;;  %1225 = vmatpush.msrb.mxu0 %v882_v12  ;;  %v2966_v61 = vsel %vm2955_vm6, %v481_v55, 0.0  ;;  %v939_v11 = vld [vmem:[%s3811_s3 + $0x3f8] sm:$0xff]  ;;  %v725_v12 = vrot.slane %v612_v53, 2  ;;  %v669_v53 = vsel %vm3979_vm10, %v666_v59, %v668_v26 }
  0xb4   : > { %1035 = vmatpush.msrb.mxu1 %v829_v28  ;;  %1101 = vmatpush.msrb.mxu2 %v844_v40  ;;  %v922_v28 = vld [vmem:[%s3811_s3 + $0x370] sm:$0xff]  ;;  %v955_v59 = vld [vmem:[%s3811_s3 + $0x478] sm:$0xff] }
  0xb5   : > { %1165 = vmatpush.msrb.mxu3 %v861_v36  ;;  %1226 = vmatpush.msrb.mxu0 %v881_v41  ;;  %v938_v36 = vld [vmem:[%s3811_s3 + $0x3f0] sm:$0xff]  ;;  %v670_v41 = vrot.slane %v2962_v58, 1  ;;  %v726_v49 = vsel %vm3853_vm8, %v723_v60, %v725_v12  ;;  %v937_v60 = vld [vmem:[%s3811_s3 + $0x3e8] sm:$0xff]  ;;  %v920_v12 = vld [vmem:[%s3811_s3 + $0x360] sm:$0xff] }
  0xb6   : > { %1036 = vmatpush.msrb.mxu1 %v828_v45  ;;  %1102 = vmatmul.f32.vlgmr.msrb.gmra.mxu2 %v724_v46  ;;  %v671_v45 = vrot.slane %v2966_v61, 1  ;;  %v906_v46 = vld [vmem:[%s3811_s3 + $0x2f0] sm:$0xff]  ;;  %v919_v26 = vld [vmem:[%s3811_s3 + $0x358] sm:$0xff] }
  0xb7   : > { %1037 = vmatmul.f32.vlgmr.msrb.gmra.mxu1 %v667_v14  ;;  %1166 = vmatpush.msrb.mxu3 %v860_v37  ;;  %v482_v14 = vmax.f32 %v452_v2, 0.0  ;;  %v936_v2 = vld [vmem:[%s3811_s3 + $0x3e0] sm:$0xff]  ;;  %v935_v40 = vld [vmem:[%s3811_s3 + $0x3d8] sm:$0xff]  ;;  %v3090_v37 = vsel %vm2521_vm7, %v2556_v22, 0.0 }
  0xb8   : > { %1227 = vmatpush.msrb.mxu0 %v880_v54  ;;  %1346 = vmatpush.msra.mxu2 %v923_v56  ;;  %v905_v54 = vld [vmem:[%s3811_s3 + $0x2e8] sm:$0xff]  ;;  %v727_v56 = vrot.slane %v2962_v58, 2  ;;  %v904_v58 = vld [vmem:[%s3811_s3 + $0x2e0] sm:$0xff] }
  0xb9   : > { %1750 = vmatmul.msk.f32.gmra.mxu0 %vm2955_vm6, %v481_v55  ;;  %1763 = vmatmul.msk.f32.vlgmr.msrb.gmra.mxu3 %vm2852_vm5, %v2832_v27  ;;  %v921_v27 = vld [vmem:[%s3811_s3 + $0x368] sm:$0xff]  ;;  %vm3018_vm5 = vmand %vm2985_vm0, %vm571_vm13 }
  0xba   : > { %1228 = vmatpush.msrb.mxu0 %v879_v62  ;;  %1411 = vmatpush.msra.mxu3 %v939_v11  ;;  %vm3980_vm13 = vmmov %vm3979_vm10  ;;  %v728_v62 = vrot.slane %v2966_v61, 2  ;;  %v615_v11 = vsel %vm3018_vm5, %v482_v14, 0.0  ;;  %v954_v61 = vld [vmem:[%s3811_s3 + $0x470] sm:$0xff]  ;;  %v616_v14 = vsel %vm2379_vm15, %v2418_v42, 0.0  ;;  %vm3986_vm5 = vnez %v3910_v24 }
  0xbb   : > { %1281 = vmatpush.msra.mxu1 %v907_v25  ;;  %1347 = vmatpush.msra.mxu2 %v922_v28  ;;  %v672_v47 = vsel %vm3980_vm13, %v670_v41, %v671_v45  ;;  %v387_v25 = vld [vmem:[%s2176_s14 + $0x40] sm:$0x3]  ;;  %v673_v28 = vrot.slane %v615_v11, 1  ;;  %vm3981_vm0 = vmmov %vm3979_vm10  ;;  %vm3988_vm13 = vnez %v3881_v13  ;;  %v945_v13 = vld [vmem:[%s3811_s3 + $0x428] sm:$0xff] }
  0xbc   : > { %1229 = vmatpush.msrb.mxu0 %v878_v33  ;;  %1412 = vmatpush.msra.mxu3 %v938_v36  ;;  %v3067_v57 = vsel %vm3853_vm8, %v727_v56, %v728_v62  ;;  %v953_v33 = vld [vmem:[%s3811_s3 + $0x468] sm:$0xff]  ;;  %v422_v36 = vmul.f32 %v2331_v15, %v387_v25  ;;  %v918_v41 = vld [vmem:[%s3811_s3 + $0x350] sm:$0xff]  ;;  %v675_v56 = vrot.slane %v616_v14, 1  ;;  %v732_v25 = vrot.slane %v616_v14, 2  ;;  %vm3984_vm2 = vmmov %vm3981_vm0 }
  0xbd   : > { %1282 = vmatpush.msra.mxu1 %v906_v46  ;;  %1348 = vmatpush.msra.mxu2 %v921_v27  ;;  %v952_v46 = vld [vmem:[%s3811_s3 + $0x460] sm:$0xff]  ;;  %v934_v27 = vld [vmem:[%s3811_s3 + $0x3d0] sm:$0xff]  ;;  %vm3987_vm10 = vmmov %vm3981_vm0 }
  0xbe   : > { %1230 = vmatpush.msrb.mxu0 %v877_v52  ;;  %1105 = vmatmul.f32.gmra.mxu2 %v726_v49  ;;  %v674_v52 = vsel %vm3981_vm0, %v671_v45, %v673_v28  ;;  %v730_v49 = vrot.slane %v615_v11, 2  ;;  %v902_v45 = vld [vmem:[%s3811_s3 + $0x2d0] sm:$0xff]  ;;  %v676_v11 = vrot.slane %v3090_v37, 1  ;;  %v390_v28 = vld [vmem:[%s2176_s14 + $0x58] sm:$0x3] }
  0xbf   : > { %1040 = vmatmul.f32.gmra.mxu1 %v669_v53  ;;  %1413 = vmatpush.msra.mxu3 %v937_v60  ;;  %v455_v53 = vadd.f32 %v2358_v23, %v422_v36  ;;  %v951_v60 = vld [vmem:[%s3811_s3 + $0x458] sm:$0xff] }
  0xc0   : > { %1231 = vmatpush.msrb.mxu0 %v876_v10  ;;  %1283 = vmatpush.msra.mxu1 %v905_v54  ;;  %v917_v10 = vld [vmem:[%s3811_s3 + $0x348] sm:$0xff] }
  0xc1   : > { %1764 = vmatmul.msk.f32.gmra.mxu3 %vm2955_vm6, %v481_v55  ;;  %1232 = vmatmul.f32.vlgmr.msrb.gmra.mxu0 %v672_v47  ;;  %v903_v55 = vld [vmem:[%s3811_s3 + $0x2d8] sm:$0xff]  ;;  %v933_v54 = vld [vmem:[%s3811_s3 + $0x3c8] sm:$0xff]  ;;  %vm3982_vm6 = vmmov %vm3981_vm0 }
  0xc2   : > { %1476 = vmatpush.msra.mxu0 %v955_v59  ;;  %1349 = vmatpush.msra.mxu2 %v920_v12  ;;  %v901_v59 = vld [vmem:[%s3811_s3 + $0x2c8] sm:$0xff]  ;;  %v3116_v12 = vsel %vm3853_vm8, %v728_v62, %v730_v49  ;;  %v916_v62 = vld [vmem:[%s3811_s3 + $0x340] sm:$0xff]  ;;  %v620_v49 = vsel %vm2818_vm11, %v2803_v6, 0.0 }
  0xc3   : > { %1414 = vmatpush.msra.mxu3 %v936_v2  ;;  %1284 = vmatpush.msra.mxu1 %v904_v58  ;;  %v485_v2 = vmax.f32 %v455_v53, 0.0  ;;  %v3120_v58 = vsel %vm3982_vm6, %v675_v56, %v676_v11  ;;  %v931_v53 = vld [vmem:[%s3811_s3 + $0x3b8] sm:$0xff]  ;;  %vm3989_vm6 = vnez %v3932_v17 }
  0xc4   : > { %1477 = vmatpush.msra.mxu0 %v954_v61  ;;  %1350 = vmatpush.msra.mxu2 %v919_v26  ;;  %v733_v61 = vrot.slane %v3090_v37, 2  ;;  %v915_v37 = vld [vmem:[%s3811_s3 + $0x338] sm:$0xff] }
  0xc5   : > { %1415 = vmatpush.msra.mxu3 %v935_v40  ;;  %1285 = vmatpush.msra.mxu1 %v903_v55  ;;  %v618_v26 = vsel %vm2299_vm4, %v485_v2, 0.0  ;;  %v932_v40 = vld [vmem:[%s3811_s3 + $0x3c0] sm:$0xff]  ;;  %vm3983_vm4 = vmmov %vm3981_vm0  ;;  %v738_v2 = vrot.slane %v620_v49, 2 }
  0xc6   : > { %1108 = vmatmul.f32.gmra.mxu2 %v3067_v57  ;;  %1478 = vmatpush.msra.mxu0 %v953_v33  ;;  %v900_v55 = vld [vmem:[%s3811_s3 + $0x2c0] sm:$0xff]  ;;  %v678_v33 = vrot.slane %v618_v26, 1  ;;  %v3143_v36 = vsel %vm3853_vm8, %v732_v25, %v733_v61 }
  0xc7   : > { %1043 = vmatmul.f32.gmra.mxu1 %v672_v47  ;;  %1351 = vmatpush.msra.mxu2 %v918_v41  ;;  %v950_v47 = vld [vmem:[%s3811_s3 + $0x450] sm:$0xff]  ;;  %v425_v41 = vmul.f32 %v2331_v15, %v390_v28 }
  0xc8   : > { %1479 = vmatpush.msra.mxu0 %v952_v46  ;;  %1416 = vmatpush.msra.mxu3 %v934_v27  ;;  %v3148_v46 = vsel %vm3983_vm4, %v676_v11, %v678_v33  ;;  %v735_v27 = vrot.slane %v618_v26, 2  ;;  %v914_v26 = vld [vmem:[%s3811_s3 + $0x330] sm:$0xff]  ;;  %vm3990_vm4 = vmmov %vm3981_vm0 }
  0xc9   : > { %1765 = vmatmul.msk.f32.gmra.mxu3 %vm2379_vm15, %v2418_v42  ;;  %1235 = vmatmul.f32.gmra.mxu0 %v674_v52  ;;  %v458_v14 = vadd.f32 %v2358_v23, %v425_v41  ;;  %v898_v28 = vld [vmem:[%s3811_s3 + $0x2b0] sm:$0xff] }
  0xca   : > { %1480 = vmatpush.msra.mxu0 %v951_v60  ;;  %1286 = vmatpush.msra.mxu1 %v902_v45  ;;  %v948_v60 = vld [vmem:[%s3811_s3 + $0x440] sm:$0xff]  ;;  %v899_v45 = vld [vmem:[%s3811_s3 + $0x2b8] sm:$0xff] }
  0xcb   : > { %1352 = vmatpush.msra.mxu2 %v917_v10  ;;  %1417 = vmatpush.msra.mxu3 %v933_v54  ;;  %v681_v54 = vrot.slane %v620_v49, 1 }
  0xcc   : > { %1481 = vmatpush.msra.mxu0 %v950_v47  ;;  %1287 = vmatpush.msra.mxu1 %v901_v59  ;;  %v3175_v47 = vsel %vm3853_vm8, %v733_v61, %v735_v27  ;;  %v488_v59 = vmax.f32 %v458_v14, 0.0  ;;  %v393_v61 = vld [vmem:[%s2176_s14 + $0x70] sm:$0x3]  ;;  %v622_v27 = vsel %vm2426_vm9, %v2420_v43, 0.0  ;;  %v913_v14 = vld [vmem:[%s3811_s3 + $0x328] sm:$0xff] }
  0xcd   : > { %1353 = vmatpush.msra.mxu2 %v916_v62  ;;  %1418 = vmatpush.msra.mxu3 %v932_v40  ;;  %v930_v62 = vld [vmem:[%s3811_s3 + $0x3b0] sm:$0xff] }
  0xce   : > { %1111 = vmatmul.f32.gmra.mxu2 %v3116_v12  ;;  %1482 = vmatpush.msra.mxu0 %v949_v9  ;;  %v621_v25 = vsel %vm2437_vm1, %v488_v59, 0.0  ;;  %vm3985_vm1 = vmmov %vm3981_vm0 }
  0xcf   : > { %1046 = vmatmul.f32.gmra.mxu1 %v674_v52  ;;  %v619_v52 = vsel %vm2670_vm12, %v2681_v16, 0.0  ;;  %1354 = vmatpush.msra.mxu2 %v915_v37  ;;  %v683_v40 = vrot.slane %v621_v25, 1  ;;  %v740_v41 = vrot.slane %v621_v25, 2  ;;  %v929_v37 = vld [vmem:[%s3811_s3 + $0x3a8] sm:$0xff]  ;;  %v742_v25 = vrot.slane %v622_v27, 2 }
  0xd0   : > { %1288 = vmatpush.msra.mxu1 %v900_v55  ;;  %v680_v10 = vrot.slane %v619_v52, 1  ;;  %1419 = vmatpush.msra.mxu3 %v931_v53  ;;  %v737_v11 = vrot.slane %v619_v52, 2  ;;  %v428_v55 = vmul.f32 %v2331_v15, %v393_v61  ;;  %v623_v52 = vsel %vm3986_vm5, %v2547_v20, 0.0  ;;  %v946_v53 = vld [vmem:[%s3811_s3 + $0x430] sm:$0xff] }
  0xd1   : > { %1766 = vmatmul.msk.f32.gmra.mxu3 %vm2521_vm7, %v2556_v22  ;;  %1238 = vmatmul.f32.gmra.mxu0 %v3120_v58  ;;  %v3207_v33 = vsel %vm3985_vm1, %v681_v54, %v683_v40  ;;  %vm3993_vm1 = vmmov %vm3981_vm0 }
  0xd2   : > { %1483 = vmatpush.msra.mxu0 %v948_v60  ;;  %1289 = vmatpush.msra.mxu1 %v899_v45  ;;  %v3179_v56 = vsel %vm3984_vm2, %v680_v10, %v681_v54  ;;  %v3202_v9 = vsel %vm3853_vm8, %v737_v11, %v738_v2  ;;  %v461_v49 = vadd.f32 %v2358_v23, %v428_v55  ;;  %v897_v60 = vld [vmem:[%s3811_s3 + $0x2a8] sm:$0xff]  ;;  %v685_v45 = vrot.slane %v622_v27, 1 }
  0xd3   : > { %1355 = vmatpush.msra.mxu2 %v914_v26  ;;  %1420 = vmatpush.msra.mxu3 %v930_v62  ;;  %v686_v10 = vrot.slane %v623_v52, 1  ;;  %v3234_v54 = vsel %vm3853_vm8, %v738_v2, %v740_v41  ;;  %v743_v26 = vrot.slane %v623_v52, 2  ;;  %v912_v62 = vld [vmem:[%s3811_s3 + $0x320] sm:$0xff]  ;;  %v396_v2 = vld [vmem:[%s2176_s14 + $0x88] sm:$0x3]  ;;  %vm3991_vm2 = vnez %v3901_v3 }
  0xd4   : > { %1484 = vmatpush.msra.mxu0 %v947_v48  ;;  %1290 = vmatpush.msra.mxu1 %v898_v28  ;;  %v491_v59 = vmax.f32 %v461_v49, 0.0  ;;  %v928_v48 = vld [vmem:[%s3811_s3 + $0x3a0] sm:$0xff]  ;;  %v431_v41 = vmul.f32 %v2331_v15, %v396_v2  ;;  %v625_v49 = vsel %vm3989_vm6, %v2674_v5, 0.0  ;;  %v911_v15 = vld [vmem:[%s3811_s3 + $0x318] sm:$0xff] }
  0xd5   : > { %1356 = vmatpush.msra.mxu2 %v913_v14  ;;  %1421 = vmatpush.msra.mxu3 %v929_v37  ;;  %v3238_v11 = vsel %vm3987_vm10, %v685_v45, %v686_v10  ;;  %v896_v28 = vld [vmem:[%s3811_s3 + $0x2a0] sm:$0xff]  ;;  %v3261_v55 = vsel %vm3853_vm8, %v742_v25, %v743_v26  ;;  %v626_v14 = vsel %vm2794_vm14, %v2788_v18, 0.0  ;;  %v690_v45 = vrot.slane %v625_v49, 1  ;;  %v943_v3 = vld [vmem:[%s3811_s3 + $0x418] sm:$0xff] }
  0xd6   : > { %1114 = vmatmul.f32.gmra.mxu2 %v3143_v36  ;;  %1485 = vmatpush.msra.mxu0 %v946_v53  ;;  %v624_v61 = vsel %vm3988_vm13, %v491_v59, 0.0  ;;  %v464_v37 = vadd.f32 %v2358_v23, %v431_v41  ;;  %v927_v53 = vld [vmem:[%s3811_s3 + $0x398] sm:$0xff]  ;;  %v748_v2 = vrot.slane %v626_v14, 2  ;;  %vm3994_vm10 = vnez %v3895_v51 }
  0xd7   : > { %1049 = vmatmul.f32.gmra.mxu1 %v3120_v58  ;;  %1357 = vmatpush.msra.mxu2 %v912_v62  ;;  %v688_v40 = vrot.slane %v624_v61, 1  ;;  %v745_v52 = vrot.slane %v624_v61, 2  ;;  %v895_v23 = vld [vmem:[%s3811_s3 + $0x298] sm:$0xff]  ;;  %v747_v62 = vrot.slane %v625_v49, 2  ;;  %v3325_v49 = vld [vmem:[%s3809_s1] ss:$0 sm:$0xff]  ;;  %vm3995_vm13 = vnez %v3917_v35 }
  0xd8   : > { %1291 = vmatpush.msra.mxu1 %v897_v60  ;;  %1422 = vmatpush.msra.mxu3 %v928_v48  ;;  %v944_v60 = vld [vmem:[%s3811_s3 + $0x420] sm:$0xff]  ;;  %v494_v25 = vmax.f32 %v464_v37, 0.0  ;;  %3992 = vst [vmem:[#allocation17_spill] sm:$0xff] %v3325_v49  ;;  %v4032_v51 = vld [vmem:[#allocation13_spill] sm:$0xff] }
  0xd9   : > { %1767 = vmatmul.msk.f32.gmra.mxu3 %vm2670_vm12, %v2681_v16  ;;  %1241 = vmatmul.f32.gmra.mxu0 %v3148_v46  ;;  %v3266_v27 = vsel %vm3981_vm0, %v686_v10, %v688_v40  ;;  %v691_v10 = vrot.slane %v626_v14, 1  ;;  %v3293_v59 = vsel %vm3853_vm8, %v743_v26, %v745_v52  ;;  %v399_v26 = vld [vmem:[%s2176_s14 + $0xa0] sm:$0x3]  ;;  %v3320_v52 = vsel %vm3853_vm8, %v747_v62, %v748_v2 }
  0xda   : > { %1486 = vmatpush.msra.mxu0 %v945_v13  ;;  %1292 = vmatpush.msra.mxu1 %v896_v28  ;;  %v627_v48 = vsel %vm3991_vm2, %v494_v25, 0.0  ;;  %v910_v13 = vld [vmem:[%s3811_s3 + $0x310] sm:$0xff]  ;;  %v434_v14 = vmul.f32 %v3325_v49, %v399_v26  ;;  %v925_v25 = vld [vmem:[%s3811_s3 + $0x388] sm:$0xff]  ;;  %vm4002_vm2 = vmmov %vm3981_vm0 }
  0xdb   : > { %1358 = vmatpush.msra.mxu2 %v911_v15  ;;  %1423 = vmatpush.msra.mxu3 %v927_v53  ;;  %v3297_v61 = vsel %vm3990_vm4, %v690_v45, %v691_v10  ;;  %v926_v28 = vld [vmem:[%s3811_s3 + $0x390] sm:$0xff]  ;;  %v693_v41 = vrot.slane %v627_v48, 1  ;;  %v750_v15 = vrot.slane %v627_v48, 2  ;;  %v628_v53 = vsel %vm3994_vm10, %v2444_v50, 0.0  ;;  %v893_v26 = vld [vmem:[%s3811_s3 + $0x288] sm:$0xff] }
  0xdc   : > { %1487 = vmatpush.msra.mxu0 %v944_v60  ;;  %1293 = vmatpush.msra.mxu1 %v895_v23  ;;  %v894_v40 = vld [vmem:[%s3811_s3 + $0x290] sm:$0xff]  ;;  %v629_v60 = vsel %vm3995_vm13, %v2590_v34, 0.0  ;;  %v3342_v23 = vld [vmem:[%s3810_s2] ss:$0 sm:$0xff]  ;;  %v695_v48 = vrot.slane %v628_v53, 1  ;;  %vm3999_vm4 = vnez %v3883_v19  ;;  %v941_v19 = vld [vmem:[%s3811_s3 + $0x408] sm:$0xff] }
  0xdd   : > { %1359 = vmatpush.msra.mxu2 %v910_v13  ;;  %1424 = vmatpush.msra.mxu3 %v926_v28  ;;  %v3330_v37 = vsel %vm3993_vm1, %v691_v10, %v693_v41  ;;  %3996 = vst [vmem:[#allocation18_spill] sm:$0xff] %v3342_v23  ;;  %v467_v45 = vadd.f32 %v3342_v23, %v434_v14  ;;  %v909_v10 = vld [vmem:[%s3811_s3 + $0x308] sm:$0xff]  ;;  %v942_v62 = vld [vmem:[%s3811_s3 + $0x410] sm:$0xff]  ;;  %v696_v13 = vrot.slane %v629_v60, 1  ;;  %v752_v14 = vrot.slane %v628_v53, 2  ;;  %v924_v53 = vld [vmem:[%s3811_s3 + $0x380] sm:$0xff] }
  0xde   : > { %1117 = vmatmul.f32.gmra.mxu2 %v3175_v47  ;;  %1488 = vmatpush.msra.mxu0 %v943_v3  ;;  %v3362_v28 = vsel %vm3853_vm8, %v748_v2, %v750_v15  ;;  %v908_v2 = vld [vmem:[%s3811_s3 + $0x300] sm:$0xff]  ;;  %v402_v15 = vld [vmem:[%s2176_s14 + $0xb8] sm:$0x3]  ;;  %vm4004_vm1 = vnez %v3944_v39  ;;  %v519_v39 = vadd.s32 8, %v2262_v63 }
  0xdf   : > { %1052 = vmatmul.f32.gmra.mxu1 %v3148_v46  ;;  %1360 = vmatpush.msra.mxu2 %v909_v10  ;;  %3997 = vst [vmem:[#allocation19_spill] sm:$0xff] %v3362_v28  ;;  %v497_v3 = vmax.f32 %v467_v45, 0.0  ;;  %v753_v10 = vrot.slane %v629_v60, 2  ;;  %v892_v60 = vld [vmem:[%s3811_s3 + $0x280] sm:$0xff] }
  0xe0   : > { %1294 = vmatpush.msra.mxu1 %v894_v40  ;;  %1425 = vmatpush.msra.mxu3 %v925_v25  ;;  %v3366_v40 = vsel %vm3981_vm0, %v695_v48, %v696_v13  ;;  %v437_v48 = vmul.f32 %v3325_v49, %v402_v15  ;;  %v632_v15 = vsel %vm2866_vm3, %v2856_v8, 0.0  ;;  %v403_v35 = vld [vmem:[%s2176_s14 + $0xc0] sm:$0xff] }
  0xe1   : > { %1768 = vmatmul.msk.f32.gmra.mxu3 %vm2818_vm11, %v2803_v6  ;;  %1244 = vmatmul.f32.gmra.mxu0 %v3179_v56  ;;  %3998 = vst [vmem:[#allocation20_spill] sm:$0xff] %v3366_v40  ;;  %v630_v25 = vsel %vm3999_vm4, %v497_v3, 0.0  ;;  %vm4007_vm4 = vnez %v3912_v30 }
  0xe2   : > { %1489 = vmatpush.msra.mxu0 %v942_v62  ;;  %1295 = vmatpush.msra.mxu1 %v893_v26  ;;  %v698_v45 = vrot.slane %v630_v25, 1  ;;  %v3391_v62 = vsel %vm3853_vm8, %v752_v14, %v753_v10  ;;  %v631_v14 = vsel %vm4004_vm1, %v2727_v38, 0.0 }
  0xe3   : > { %1361 = vmatpush.msra.mxu2 %v908_v2  ;;  %1426 = vmatpush.msra.mxu3 %v924_v53  ;;  %4000 = vst [vmem:[#allocation21_spill] sm:$0xff] %v3391_v62 }
  0xe4   : > { %1490 = vmatpush.msra.mxu0 %v941_v19  ;;  %1296 = vmatpush.msra.mxu1 %v892_v60  ;;  %v3398_v3 = vsel %vm4002_vm2, %v696_v13, %v698_v45  ;;  %v755_v19 = vrot.slane %v630_v25, 2  ;;  %v470_v60 = vadd.f32 %v3342_v23, %v437_v48  ;;  %v404_v13 = vld [vmem:[%s2176_s14 + $0xc8] sm:$0xff]  ;;  %v940_v25 = vld [vmem:[%s3811_s3 + $0x400] sm:$0xff]  ;;  %v700_v45 = vrot.slane %v631_v14, 1 }
  0xe5   : > { %vm538_vm2 = vcmp.ge.s32.totalorder %v519_v39, 1 }
  0xe6   : > { %1120 = vmatmul.f32.gmra.mxu2 %v3202_v9  ;;  %1491 = vmatpush.msra.mxu0 %v940_v25  ;;  %v500_v48 = vmax.f32 %v470_v60, 0.0 }
  0xe7   : > { %1055 = vmatmul.f32.gmra.mxu1 %v3179_v56 }
  0xe8   : > { %v633_v60 = vsel %vm4007_vm4, %v500_v48, 0.0  ;;  %v4011_v48 = vmov 0 }
  0xe9   : > { %1769 = vmatmul.msk.f32.gmra.mxu3 %vm2426_vm9, %v2420_v43  ;;  %1247 = vmatmul.f32.gmra.mxu0 %v3207_v33 }
  0xee   : > { %1123 = vmatmul.f32.gmra.mxu2 %v3234_v54 }
  0xef   : > { %1058 = vmatmul.f32.gmra.mxu1 %v3207_v33 }
  0xf1   : > { %1770 = vmatmul.msk.f32.gmra.mxu3 %vm3986_vm5, %v2547_v20  ;;  %1250 = vmatmul.f32.gmra.mxu0 %v3238_v11 }
  0xf6   : > { %1126 = vmatmul.f32.gmra.mxu2 %v3261_v55 }
  0xf7   : > { %1061 = vmatmul.f32.gmra.mxu1 %v3238_v11 }
  0xf9   : > { %1771 = vmatmul.msk.f32.gmra.mxu3 %vm3989_vm6, %v2674_v5  ;;  %1253 = vmatmul.f32.gmra.mxu0 %v3266_v27 }
  0xfe   : > { %1129 = vmatmul.f32.gmra.mxu2 %v3293_v59 }
  0xff   : > { %1064 = vmatmul.f32.gmra.mxu1 %v3266_v27 }
 0x101   : > { %1772 = vmatmul.msk.f32.gmra.mxu3 %vm2794_vm14, %v2788_v18  ;;  %1256 = vmatmul.f32.gmra.mxu0 %v3297_v61 }
 0x106   : > { %1132 = vmatmul.f32.gmra.mxu2 %v3320_v52 }
 0x107   : > { %1067 = vmatmul.f32.gmra.mxu1 %v3297_v61 }
 0x109   : > { %1773 = vmatmul.msk.f32.gmra.mxu3 %vm3994_vm10, %v2444_v50  ;;  %1259 = vmatmul.f32.gmra.mxu0 %v3330_v37 }
 0x10e   : > { %1135 = vmatmul.f32.gmra.mxu2 %v3362_v28  ;;  %v3368_v41 = vpop.f32.mrf.mxu1  ;;  %v439_v28 = vmul.f32 %v3325_v49, %v404_v13 }
 0x10f   : > { %1070 = vmatmul.f32.gmra.mxu1 %v3330_v37 }
 0x110   : > { %v472_v13 = vadd.f32 %v3342_v23, %v439_v28 }
 0x111   : > { %1774 = vmatmul.msk.f32.gmra.mxu3 %vm3995_vm13, %v2590_v34  ;;  %1262 = vmatmul.f32.gmra.mxu0 %v3366_v40  ;;  %v3424_v34 = vsel %vm3853_vm8, %v753_v10, %v755_v19  ;;  %v757_v10 = vrot.slane %v631_v14, 2  ;;  %v758_v19 = vrot.slane %v632_v15, 2  ;;  %v703_v14 = vrot.slane %v633_v60, 1 }
 0x112   : > { %v3455_v30 = vmax.f32 %v472_v13, 0.0  ;;  %vm4023_vm13 = vcmp.le.s32.totalorder %v519_v39, 16 }
 0x114   : > { %v3394_v26 = vpop.f32.mrf.mxu2  ;;  %4010 = vst [vmem:[#allocation27_spill] sm:$0xff] %v3455_v30 }
 0x115   : > { %4001 = vst [vmem:[#allocation22_spill] sm:$0xff] %v3394_v26 }
 0x116   : > { %1138 = vmatmul.f32.gmra.mxu2 %v3391_v62  ;;  %v3400_v2 = vpop.f32.mrf.mxu3  ;;  %v3412_v62 = vpop.f32.mrf.mxu0 }
 0x117   : > { %4003 = vst [vmem:[#allocation23_spill] sm:$0xff] %v3400_v2  ;;  %1073 = vmatmul.f32.gmra.mxu1 %v3366_v40  ;;  %v3403_v53 = vpop.f32.mrf.mxu1  ;;  %v701_v2 = vrot.slane %v632_v15, 1  ;;  %v3450_v15 = vsel %vm3853_vm8, %v757_v10, %v758_v19  ;;  %v4015_v10 = vmov 0 }
 0x118   : > { %4008 = vst [vmem:[#allocation26_spill] sm:$0xff] %v3450_v15 }
 0x119   : > { %1775 = vmatmul.msk.f32.gmra.mxu3 %vm4004_vm1, %v2727_v38  ;;  %1265 = vmatmul.f32.gmra.mxu0 %v3398_v3  ;;  %v438_v38 = vmul.f32 %v3325_v49, %v403_v35  ;;  %v3433_v26 = vsel %vm3981_vm0, %v700_v45, %v701_v2  ;;  %v405_v35 = vld [vmem:[%s2176_s14 + $0xd0] sm:$0x3]  ;;  %vm4009_vm0 = vcmp.ge.s32.totalorder %v2267_v1, 1  ;;  %vm3859_vm1 = vcmp.le.s32.totalorder %v519_v39, 16 }
 0x11a   : > { %vm564_vm4 = vmand %vm4009_vm0, %vm538_vm2  ;;  %v440_v28 = vmul.f32 %v3325_v49, %v405_v35  ;;  %vm4018_vm0 = vcmask 1046528  }
 0x11b   : > { %v471_v45 = vadd.f32 %v3342_v23, %v438_v38  ;;  %vm3470_vm8 = vmand %vm564_vm4, %vm3859_vm1  ;;  %v3475_v13 = vsel %vm4018_vm0, %v701_v2, %v703_v14  ;;  %vm4019_vm4 = vcmp.le.s32.totalorder %v2276_v4, 16 }
 0x11c   : > { %v3427_v40 = vpop.f32.mrf.mxu2  ;;  %v4016_v10 = vsel %vm3470_vm8, 4294967295, %v4015_v10  ;;  %v473_v49 = vadd.f32 %v3342_v23, %v440_v28  ;;  %vm566_vm0 = vmand %vm4019_vm4, %vm538_vm2  ;;  %vm4024_vm4 = vcmask 1046528  }
 0x11d   : > { %4005 = vst [vmem:[#allocation24_spill] sm:$0xff] %v3427_v40  ;;  %v3464_v38 = vmax.f32 %v471_v45, 0.0  ;;  %v760_v45 = vrot.slane %v633_v60, 2 }
 0x11e   : > { %1141 = vmatmul.f32.gmra.mxu2 %v3424_v34  ;;  %4017 = vst [vmem:[#allocation30_spill] sm:$0xff] %v4016_v10  ;;  %v503_v23 = vmax.f32 %v473_v49, 0.0 }
 0x11f   : > { %1076 = vmatmul.f32.gmra.mxu1 %v3398_v3  ;;  %v3436_v25 = vpop.f32.mrf.mxu3  ;;  %4014 = vst [vmem:[#allocation29_spill] sm:$0xff] %v3464_v38  ;;  %v3481_v35 = vsel %vm3470_vm8, %v3464_v38, 0.0 }
 0x120   : > { %4006 = vst [vmem:[#allocation25_spill] sm:$0xff] %v3436_v25  ;;  %v3441_v40 = vpop.f32.mrf.mxu1  ;;  %v781_v14 = vrot.slane %v3481_v35, 1 }
 0x121   : > { %1776 = vmatmul.msk.f32.gmra.mxu3 %vm2866_vm3, %v2856_v8  ;;  %1268 = vmatmul.f32.gmra.mxu0 %v3433_v26  ;;  %vm3460_vm3 = vmand %vm538_vm2, %vm3859_vm1  ;;  %vm4021_vm1 = vcmask 1045504  }
 0x122   : > { %v976_v25 = vpop.f32.mrf.mxu0  ;;  %v4012_v48 = vsel %vm3460_vm3, 4294967295, %v4011_v48  ;;  %v3486_v1 = vsel %vm3460_vm3, %v3455_v30, 0.0  ;;  %v3503_v28 = vsel %vm4021_vm1, %v758_v19, %v760_v45  ;;  %vm606_vm2 = vmand %vm566_vm0, %vm4023_vm13 }
 0x123   : > { %4013 = vst [vmem:[#allocation28_spill] sm:$0xff] %v4012_v48  ;;  %vm4028_vm13 = vmmov %vm4024_vm4 }
 0x124   : > { %4022 = vst [vmem:[#allocation32_spill] sm:$0xff] %v3503_v28 }
 0x125   : > { %v3466_v63 = vpop.f32.mrf.mxu2 }
 0x126   : > { %1144 = vmatmul.f32.gmra.mxu2 %v3450_v15  ;;  %v782_v15 = vrot.slane %v3486_v1, 1 }
 0x127   : > { %1079 = vmatmul.f32.gmra.mxu1 %v3433_v26 }
 0x128   : > { %v3508_v10 = vsel %vm4024_vm4, %v781_v14, %v782_v15 }
 0x129   : > { %1777 = vmatmul.msk.f32.gmra.mxu3 %vm3470_vm8, %v3464_v38  ;;  %1271 = vmatmul.f32.gmra.mxu0 %v3475_v13  ;;  %v3496_v2 = vpop.f32.mrf.mxu3  ;;  %4025 = vst [vmem:[#allocation33_spill] sm:$0xff] %v3508_v10  ;;  %v3513_v38 = vsel %vm606_vm2, %v503_v23, 0.0  ;;  %vm4063_vm2 = vmmov %vm4024_vm4 }
 0x12a   : > { %4020 = vst [vmem:[#allocation31_spill] sm:$0xff] %v3496_v2  ;;  %v3498_v60 = vpop.f32.mrf.mxu1  ;;  %v784_v39 = vrot.slane %v3513_v38, 1 }
 0x12b   : > { %4026 = vst [vmem:[#allocation34_spill] sm:$0xff] %v3513_v38 }
 0x12c   : > { %v979_v4 = vpop.f32.mrf.mxu0  ;;  %v3526_v14 = vsel %vm4028_vm13, %v782_v15, %v784_v39  ;;  %vm4066_vm13 = vmmov %vm4063_vm2 }
 0x12e   : > { %1147 = vmatmul.f32.gmra.mxu2 %v3503_v28 }
 0x12f   : > { %1082 = vmatmul.f32.gmra.mxu1 %v3475_v13  ;;  %v3511_v2 = vpop.f32.mrf.mxu2 }
 0x131   : > { %1778 = vmatmul.msk.f32.gmra.mxu3 %vm3460_vm3, %v3455_v30  ;;  %1274 = vmatmul.f32.gmra.mxu0 %v3508_v10 }
 0x133   : > { %v3520_v49 = vpop.f32.mrf.mxu3 }
 0x134   : > { %4027 = vst [vmem:[#allocation35_spill] sm:$0xff] %v3520_v49  ;;  %v1038_v19 = vpop.f32.mrf.mxu1 }
 0x135   : > { %v1039_v23 = vadd.f32 %v1038_v19, %v3412_v62 }
 0x136   : > { %v982_v45 = vpop.f32.mrf.mxu0  ;;  %1779 = vmatmul.msk.f32.vlgmr.msra.gmra.mxu2 %vm2379_vm15, %v2418_v42  ;;  %vm4041_vm15 = vnez %v3962_v29 }
 0x137   : > { %1297 = vmatmul.f32.vlgmr.msra.gmra.mxu1 %v3067_v57 }
 0x139   : > { %1277 = vmatmul.f32.gmra.mxu0 %v3526_v14  ;;  %1427 = vmatmul.f32.vlgmr.msra.gmra.mxu3 %v3120_v58  ;;  %v1103_v38 = vpop.f32.mrf.mxu2 }
 0x13a   : > { %v1104_v48 = vadd.f32 %v1103_v38, %v1039_v23 }
 0x13c   : > { %v1041_v49 = vpop.f32.mrf.mxu1  ;;  %v1168_v30 = vpop.f32.mrf.mxu3 }
 0x13d   : > { %v3532_v28 = vadd.f32 %v1168_v30, %v1104_v48  ;;  %v1042_v31 = vadd.f32 %v1041_v49, %v976_v25 }
 0x13e   : > { %v3534_v10 = vpop.f32.mrf.mxu0  ;;  %1780 = vmatmul.msk.f32.gmra.mxu2 %vm2521_vm7, %v2556_v22 }
 0x13f   : > { %1300 = vmatmul.f32.gmra.mxu1 %v3116_v12 }
 0x141   : > { %1430 = vmatmul.f32.gmra.mxu3 %v3148_v46  ;;  %1492 = vmatmul.f32.vlgmr.msra.gmra.mxu0 %v3143_v36  ;;  %v1106_v42 = vpop.f32.mrf.mxu2 }
 0x142   : > { %v1107_v57 = vadd.f32 %v1106_v42, %v1042_v31 }
 0x144   : > { %v1044_v58 = vpop.f32.mrf.mxu1  ;;  %v1171_v62 = vpop.f32.mrf.mxu3 }
 0x145   : > { %v3542_v15 = vadd.f32 %v1171_v62, %v1107_v57  ;;  %v1045_v7 = vadd.f32 %v1044_v58, %v979_v4 }
 0x146   : > { %v3544_v30 = vpop.f32.mrf.mxu0  ;;  %1781 = vmatmul.msk.f32.gmra.mxu2 %vm2670_vm12, %v2681_v16 }
 0x147   : > { %1303 = vmatmul.f32.gmra.mxu1 %v3143_v36 }
 0x149   : > { %1433 = vmatmul.f32.gmra.mxu3 %v3179_v56  ;;  %1495 = vmatmul.f32.gmra.mxu0 %v3175_v47  ;;  %v1109_v22 = vpop.f32.mrf.mxu2 }
 0x14a   : > { %v1110_v12 = vadd.f32 %v1109_v22, %v1045_v7 }
 0x14c   : > { %v1047_v46 = vpop.f32.mrf.mxu1  ;;  %v1174_v25 = vpop.f32.mrf.mxu3 }
 0x14d   : > { %v3552_v48 = vadd.f32 %v1174_v25, %v1110_v12  ;;  %v1048_v0 = vadd.f32 %v1047_v46, %v982_v45  ;;  %v788_v12 = vrot.slane %v3481_v35, 2  ;;  %v789_v46 = vrot.slane %v3486_v1, 2 }
 0x14e   : > { %v3554_v38 = vpop.f32.mrf.mxu0  ;;  %1782 = vmatmul.msk.f32.gmra.mxu2 %vm2818_vm11, %v2803_v6 }
 0x14f   : > { %1306 = vmatmul.f32.gmra.mxu1 %v3175_v47 }
 0x151   : > { %1436 = vmatmul.f32.gmra.mxu3 %v3207_v33  ;;  %1498 = vmatmul.f32.gmra.mxu0 %v3202_v9  ;;  %v1112_v4 = vpop.f32.mrf.mxu2 }
 0x152   : > { %v1113_v16 = vadd.f32 %v1112_v4, %v1048_v0 }
 0x154   : > { %v1050_v36 = vpop.f32.mrf.mxu1  ;;  %v1177_v56 = vpop.f32.mrf.mxu3 }
 0x155   : > { %v3562_v39 = vadd.f32 %v1177_v56, %v1113_v16  ;;  %v1051_v6 = vadd.f32 %v1050_v36, %v3368_v41  ;;  %v4035_v36 = vld [vmem:[#allocation24_spill] sm:$0xff] }
 0x156   : > { %v3564_v49 = vpop.f32.mrf.mxu0  ;;  %1783 = vmatmul.msk.f32.gmra.mxu2 %vm2426_vm9, %v2420_v43  ;;  %vm4036_vm9 = vmmov %vm4021_vm1 }
 0x157   : > { %1309 = vmatmul.f32.gmra.mxu1 %v3202_v9  ;;  %v3629_v35 = vsel %vm4036_vm9, %v788_v12, %v789_v46  ;;  %v4045_v12 = vld [vmem:[#allocation29_spill] sm:$0xff]  ;;  %vm4064_vm4 = vmmov %vm4036_vm9 }
 0x158   : > { %vm4069_vm9 = vmmov %vm4064_vm4 }
 0x159   : > { %1439 = vmatmul.f32.gmra.mxu3 %v3238_v11  ;;  %1501 = vmatmul.f32.gmra.mxu0 %v3234_v54  ;;  %v1115_v32 = vpop.f32.mrf.mxu2 }
 0x15a   : > { %v1116_v47 = vadd.f32 %v1115_v32, %v1051_v6  ;;  %v4037_v6 = vld [vmem:[#allocation21_spill] sm:$0xff] }
 0x15c   : > { %v1053_v33 = vpop.f32.mrf.mxu1  ;;  %v1180_v19 = vpop.f32.mrf.mxu3 }
 0x15d   : > { %v3573_v45 = vadd.f32 %v1180_v19, %v1116_v47  ;;  %v1054_v43 = vadd.f32 %v1053_v33, %v3403_v53 }
 0x15e   : > { %v3575_v23 = vpop.f32.mrf.mxu0  ;;  %1784 = vmatmul.msk.f32.gmra.mxu2 %vm3986_vm5, %v2547_v20 }
 0x15f   : > { %1312 = vmatmul.f32.gmra.mxu1 %v3234_v54 }
 0x161   : > { %1442 = vmatmul.f32.gmra.mxu3 %v3266_v27  ;;  %1504 = vmatmul.f32.gmra.mxu0 %v3261_v55  ;;  %v1118_v44 = vpop.f32.mrf.mxu2 }
 0x162   : > { %v1119_v9 = vadd.f32 %v1118_v44, %v1054_v43 }
 0x164   : > { %v1056_v11 = vpop.f32.mrf.mxu1  ;;  %v1183_v41 = vpop.f32.mrf.mxu3 }
 0x165   : > { %v3584_v31 = vadd.f32 %v1183_v41, %v1119_v9  ;;  %v1057_v20 = vadd.f32 %v1056_v11, %v3441_v40  ;;  %v4038_v9 = vld [vmem:[#allocation15_spill] sm:$0xff]  ;;  %v4039_v11 = vld [vmem:[#allocation16_spill] sm:$0xff] }
 0x166   : > { %v3586_v42 = vpop.f32.mrf.mxu0  ;;  %1785 = vmatmul.msk.f32.gmra.mxu2 %vm3989_vm6, %v2674_v5  ;;  %vm4040_vm11 = vnez %v4039_v11 }
 0x167   : > { %1315 = vmatmul.f32.gmra.mxu1 %v3261_v55 }
 0x169   : > { %1445 = vmatmul.f32.gmra.mxu3 %v3297_v61  ;;  %1507 = vmatmul.f32.gmra.mxu0 %v3293_v59  ;;  %v1121_v24 = vpop.f32.mrf.mxu2 }
 0x16a   : > { %v1122_v54 = vadd.f32 %v1121_v24, %v1057_v20 }
 0x16c   : > { %v1059_v27 = vpop.f32.mrf.mxu1  ;;  %v1186_v53 = vpop.f32.mrf.mxu3 }
 0x16d   : > { %v3595_v57 = vadd.f32 %v1186_v53, %v1122_v54  ;;  %v1060_v5 = vadd.f32 %v1059_v27, %v3498_v60 }
 0x16e   : > { %v3597_v58 = vpop.f32.mrf.mxu0  ;;  %1786 = vmatmul.msk.f32.gmra.mxu2 %vm2794_vm14, %v2788_v18  ;;  %v4029_v18 = vld [vmem:[#allocation22_spill] sm:$0xff] }
 0x16f   : > { %1318 = vmatmul.f32.gmra.mxu1 %v3293_v59  ;;  %v4030_v59 = vld [vmem:[#allocation20_spill] sm:$0xff] }
 0x171   : > { %1448 = vmatmul.f32.gmra.mxu3 %v3330_v37  ;;  %1510 = vmatmul.f32.gmra.mxu0 %v3320_v52  ;;  %v1124_v17 = vpop.f32.mrf.mxu2  ;;  %v4031_v37 = vld [vmem:[#allocation19_spill] sm:$0xff] }
 0x172   : > { %v1125_v55 = vadd.f32 %v1124_v17, %v1060_v5 }
 0x174   : > { %v1062_v61 = vpop.f32.mrf.mxu1  ;;  %v1189_v40 = vpop.f32.mrf.mxu3 }
 0x175   : > { %v3606_v62 = vadd.f32 %v1189_v40, %v1125_v55  ;;  %v1063_v21 = vadd.f32 %v1062_v61, %v4029_v18  ;;  %v406_v55 = vld [vmem:[%s2176_s14 + $0xd8] sm:$0xff]  ;;  %v4042_v61 = vld [vmem:[#allocation26_spill] sm:$0xff] }
 0x176   : > { %v3608_v7 = vpop.f32.mrf.mxu0  ;;  %1787 = vmatmul.msk.f32.gmra.mxu2 %vm3994_vm10, %v2444_v50  ;;  %v4033_v50 = vld [vmem:[#allocation14_spill] sm:$0xff] }
 0x177   : > { %1321 = vmatmul.f32.gmra.mxu1 %v3320_v52  ;;  %vm4034_vm7 = vnez %v4033_v50  ;;  %v4043_v18 = vld [vmem:[#allocation10_spill] sm:$0xff] }
 0x179   : > { %1451 = vmatmul.f32.gmra.mxu3 %v4030_v59  ;;  %1513 = vmatmul.f32.gmra.mxu0 %v4031_v37  ;;  %v1127_v60 = vpop.f32.mrf.mxu2 }
 0x17a   : > { %v1128_v22 = vadd.f32 %v1127_v60, %v1063_v21  ;;  %v520_v21 = vadd.s32 9, %v4043_v18 }
 0x17c   : > { %v1065_v25 = vpop.f32.mrf.mxu1  ;;  %v1192_v0 = vpop.f32.mrf.mxu3  ;;  %vm539_vm12 = vcmp.ge.s32.totalorder %v520_v21, 1  ;;  %vm579_vm6 = vcmp.le.s32.totalorder %v520_v21, 16 }
 0x17d   : > { %v1193_v4 = vadd.f32 %v1192_v0, %v1128_v22  ;;  %v1066_v56 = vadd.f32 %v1065_v25, %v4035_v36  ;;  %v4047_v0 = vld [vmem:[#allocation18_spill] sm:$0xff]  ;;  %v4049_v36 = vld [vmem:[#allocation11_spill] sm:$0xff]  ;;  %vm3679_vm10 = vmand %vm539_vm12, %vm579_vm6 }
 0x17e   : > { %v1257_v16 = vpop.f32.mrf.mxu0  ;;  %1788 = vmatmul.msk.f32.gmra.mxu2 %vm4034_vm7, %v4032_v51  ;;  %v4048_v51 = vld [vmem:[#allocation23_spill] sm:$0xff]  ;;  %vm4050_vm14 = vcmp.ge.s32.totalorder %v4049_v36, 1  ;;  %vm4067_vm7 = vmmov %vm4064_vm4 }
 0x17f   : > { %v3622_v52 = vadd.f32 %v1257_v16, %v1193_v4  ;;  %1324 = vmatmul.f32.gmra.mxu1 %v4031_v37  ;;  %v4044_v37 = vld [vmem:[#allocation17_spill] sm:$0xff]  ;;  %vm567_vm5 = vmand %vm4050_vm14, %vm539_vm12 }
 0x180   : > { %v441_v29 = vmul.f32 %v4044_v37, %v406_v55 }
 0x181   : > { %1454 = vmatmul.f32.gmra.mxu3 %v3398_v3  ;;  %1516 = vmatmul.f32.gmra.mxu0 %v4037_v6  ;;  %v1130_v32 = vpop.f32.mrf.mxu2 }
 0x182   : > { %v1131_v47 = vadd.f32 %v1130_v32, %v1066_v56  ;;  %v474_v4 = vadd.f32 %v4047_v0, %v441_v29  ;;  %v408_v56 = vld [vmem:[%s2176_s14 + $0xe8] sm:$0x3]  ;;  %v4052_v32 = vld [vmem:[#allocation32_spill] sm:$0xff] }
 0x184   : > { %v1068_v33 = vpop.f32.mrf.mxu1  ;;  %v1195_v19 = vpop.f32.mrf.mxu3 }
 0x185   : > { %v1196_v43 = vadd.f32 %v1195_v19, %v1131_v47  ;;  %v1069_v3 = vadd.f32 %v1068_v33, %v3466_v63  ;;  %v504_v19 = vmax.f32 %v474_v4, 0.0 }
 0x186   : > { %v1260_v44 = vpop.f32.mrf.mxu0  ;;  %1789 = vmatmul.msk.f32.gmra.mxu2 %vm4040_vm11, %v4038_v9  ;;  %v443_v9 = vmul.f32 %v4044_v37, %v408_v56 }
 0x187   : > { %v3636_v41 = vadd.f32 %v1260_v44, %v1196_v43  ;;  %1327 = vmatmul.f32.gmra.mxu1 %v4037_v6  ;;  %v4051_v6 = vld [vmem:[#allocation33_spill] sm:$0xff] }
 0x189   : > { %1457 = vmatmul.f32.gmra.mxu3 %v3433_v26  ;;  %1519 = vmatmul.f32.gmra.mxu0 %v3424_v34  ;;  %v1133_v20 = vpop.f32.mrf.mxu2  ;;  %v407_v26 = vld [vmem:[%s2176_s14 + $0xe0] sm:$0xff]  ;;  %s1804_s14 = sshll.u32 %s2010_s18, 4 }
 0x18a   : > { %v1134_v24 = vadd.f32 %v1133_v20, %v1069_v3  ;;  %s1570_s30 = sadd.s32 %s1804_s14, %s1798_s24  ;;  %s1950_s24 = scalar_lea.hbm %s3812_s4, 512 }
 0x18b   : > { %s1799_s5 = sshll.u32 %s1570_s30, 3 }
 0x18c   : > { %v1071_v54 = vpop.f32.mrf.mxu1  ;;  %v1198_v27 = vpop.f32.mrf.mxu3  ;;  %s1572_s19 = scalar_lea.hbm %s3812_s4, %s1799_s5 }
 0x18d   : > { %v1199_v53 = vadd.f32 %v1198_v27, %v1134_v24  ;;  %v1072_v63 = vadd.f32 %v1071_v54, %v3511_v2  ;;  %v4057_v27 = vld [vmem:[#allocation27_spill] sm:$0xff]  ;;  %s1575_s9 = sshll.u32 %s1572_s19, 4  ;;  %s1576_s9 = int_to_ptr.hbm [resolvable:$true] %s1575_s9 }
 0x18e   : > { %v1263_v5 = vpop.f32.mrf.mxu0  ;;  %1790 = vmatmul.msk.f32.gmra.mxu2 %vm4041_vm15, %v2856_v8  ;;  %v442_v8 = vmul.f32 %v4044_v37, %v407_v26  ;;  %v476_v26 = vadd.f32 %v4047_v0, %v443_v9  ;;  %s1944_s13 = sshra.s32 %s1576_s9, 4  ;;  %s1945_s13 = int_to_ptr.hbm [resolvable:$true] %s1944_s13 }
 0x18f   : > { %v3645_v17 = vadd.f32 %v1263_v5, %v1199_v53  ;;  %1330 = vmatmul.f32.gmra.mxu1 %v3424_v34  ;;  %s1946_s23 = scalar_lea.hbm %s1945_s13, 128  ;;  %p1951_p6 = scmp.lt.s32.totalorder %s1945_s13, %s3812_s4 }
 0x190   : > { %v475_v16 = vadd.f32 %v4047_v0, %v442_v8  ;;  %p1947_p2 = scmp.ne.s32.totalorder %s1945_s13, %s1946_s23  ;;  %p1952_p7 = scmp.lt.s32.totalorder %s1950_s24, %s1946_s23 }
 0x191   : > { %1460 = vmatmul.f32.gmra.mxu3 %v3475_v13  ;;  %1522 = vmatmul.f32.gmra.mxu0 %v4042_v61  ;;  %v1136_v40 = vpop.f32.mrf.mxu2 }
 0x192   : > { %v1137_v59 = vadd.f32 %v1136_v40, %v1072_v63  ;;  %v505_v44 = vmax.f32 %v475_v16, 0.0  ;;  %p1948_p4 = pnand %p1947_p2, %p2106_p3  ;;  %p1953_p9 = por %p1952_p7, %p1951_p6 }
 0x194   : > { %v1074_v60 = vpop.f32.mrf.mxu1  ;;  %v1201_v22 = vpop.f32.mrf.mxu3  ;;  %v638_v55 = vsel %vm3679_vm10, %v505_v44, 0.0  ;;  %p1949_p5 = pneg %p1948_p4 }
 0x195   : > { %v1202_v34 = vadd.f32 %v1201_v22, %v1137_v59  ;;  %v1075_v50 = vadd.f32 %v1074_v60, %v4048_v51  ;;  %v4060_v59 = vld [vmem:[#allocation12_spill] sm:$0xff]  ;;  %v799_v8 = vrot.slane %v638_v55, 1  ;;  %v4062_v60 = vld [vmem:[#allocation34_spill] sm:$0xff] }
 0x196   : > { %v1266_v2 = vpop.f32.mrf.mxu0  ;;  %1791 = vmatmul.msk.f32.gmra.mxu2 %vm3470_vm8, %v4045_v12  ;;  %vm3672_vm8 = vmand %vm567_vm5, %vm579_vm6  ;;  %v791_v22 = vrot.slane %v4062_v60, 2  ;;  %v1237_v60 = vadd.f32 %v3544_v30, %v3542_v15  ;;  %p1954_p10 = pnand %p1953_p9, %p1949_p5 }
 0x197   : > { %v3659_v13 = vadd.f32 %v1266_v2, %v1202_v34  ;;  %1333 = vmatmul.f32.gmra.mxu1 %v4042_v61  ;;  %v637_v63 = vsel %vm3672_vm8, %v504_v19, 0.0  ;;  %v4059_v61 = vld [vmem:[#allocation25_spill] sm:$0xff]  ;;  %v506_v34 = vmax.f32 %v476_v26, 0.0 }
 0x198   : > { %v798_v29 = vrot.slane %v637_v63, 1  ;;  %v792_v4 = vsel %vm4064_vm4, %v789_v46, %v791_v22  ;;  %v805_v56 = vrot.slane %v637_v63, 2 }
 0x199   : > { %1463 = vmatmul.f32.gmra.mxu3 %v4051_v6  ;;  %1525 = vmatmul.f32.gmra.mxu0 %v4052_v32  ;;  %v1139_v47 = vpop.f32.mrf.mxu2 }
 0x19a   : > { %v1140_v33 = vadd.f32 %v1139_v47, %v1075_v50  ;;  %v4065_v50 = vld [vmem:[#allocation31_spill] sm:$0xff]  ;;  %v806_v47 = vrot.slane %v638_v55, 2 }
 0x19c   : > { %v1077_v11 = vpop.f32.mrf.mxu1  ;;  %v1204_v3 = vpop.f32.mrf.mxu3 }
 0x19d   : > { %v1205_v24 = vadd.f32 %v1204_v3, %v1140_v33  ;;  %v1078_v40 = vadd.f32 %v1077_v11, %v4059_v61  ;;  %v4068_v11 = vld [vmem:[#allocation35_spill] sm:$0xff] }
 0x19e   : > { %v1269_v54 = vpop.f32.mrf.mxu0  ;;  %1792 = vmatmul.msk.f32.gmra.mxu2 %vm3460_vm3, %v4057_v27  ;;  %vm4061_vm3 = vcmp.le.s32.totalorder %v4060_v59, 16 }
 0x19f   : > { %v3686_v5 = vadd.f32 %v1269_v54, %v1205_v24  ;;  %1336 = vmatmul.f32.gmra.mxu1 %v4052_v32  ;;  %vm569_vm1 = vmand %vm4061_vm3, %vm539_vm12 }
 0x1a0   : > { %vm609_vm0 = vmand %vm569_vm1, %vm579_vm6 }
 0x1a1   : > { %1466 = vmatmul.f32.gmra.mxu3 %v3526_v14  ;;  %1528 = vmatmul.f32.gmra.mxu0 %v3629_v35  ;;  %v1142_v18 = vpop.f32.mrf.mxu2  ;;  %v800_v14 = vsel %vm4063_vm2, %v798_v29, %v799_v8  ;;  %v639_v51 = vsel %vm609_vm0, %v506_v34, 0.0 }
 0x1a2   : > { %v1143_v37 = vadd.f32 %v1142_v18, %v1078_v40  ;;  %v801_v32 = vrot.slane %v639_v51, 1  ;;  %v808_v27 = vrot.slane %v639_v51, 2 }
 0x1a4   : > { %v1080_v2 = vpop.f32.mrf.mxu1  ;;  %v1207_v12 = vpop.f32.mrf.mxu3  ;;  %v802_v46 = vsel %vm4066_vm13, %v799_v8, %v801_v32  ;;  %v809_v26 = vsel %vm4069_vm9, %v806_v47, %v808_v27 }
 0x1a5   : > { %v1208_v25 = vadd.f32 %v1207_v12, %v1143_v37  ;;  %v1081_v36 = vadd.f32 %v1080_v2, %v4065_v50 }
 0x1a6   : > { %v1272_v0 = vpop.f32.mrf.mxu0  ;;  %1793 = vmatmul.msk.f32.gmra.mxu2 %vm3672_vm8, %v504_v19 }
 0x1a7   : > { %v3708_v16 = vadd.f32 %v1272_v0, %v1208_v25  ;;  %1339 = vmatmul.f32.gmra.mxu1 %v3629_v35  ;;  %v807_v35 = vsel %vm4067_vm7, %v805_v56, %v806_v47 }
 0x1a9   : > { %1469 = vmatmul.f32.gmra.mxu3 %v800_v14  ;;  %1531 = vmatmul.f32.gmra.mxu0 %v792_v4  ;;  %v1145_v21 = vpop.f32.mrf.mxu2  ;;  %v1240_v14 = vadd.f32 %v3554_v38, %v3552_v48 }
 0x1aa   : > { %v1146_v6 = vadd.f32 %v1145_v21, %v1081_v36 }
 0x1ac   : > { %v1083_v33 = vpop.f32.mrf.mxu1  ;;  %v1210_v19 = vpop.f32.mrf.mxu3 }
 0x1ad   : > { %v1211_v43 = vadd.f32 %v1210_v19, %v1146_v6  ;;  %v1084_v3 = vadd.f32 %v1083_v33, %v4068_v11  ;;  %v1243_v6 = vadd.f32 %v3564_v49, %v3562_v39 }
 0x1ae   : > { %v1275_v1 = vpop.f32.mrf.mxu0  ;;  %1794 = vmatmul.msk.f32.gmra.mxu2 %vm3679_vm10, %v505_v44  ;;  %v1234_v44 = vadd.f32 %v3534_v10, %v3532_v28 }
 0x1af   : > { %v3716_v9 = vadd.f32 %v1275_v1, %v1211_v43  ;;  %1342 = vmatmul.f32.gmra.mxu1 %v792_v4 }
 0x1b1   : > { %1472 = vmatmul.f32.gmra.mxu3 %v802_v46  ;;  %1534 = vmatmul.f32.gmra.mxu0 %v807_v35  ;;  %v1148_v24 = vpop.f32.mrf.mxu2  ;;  %v1246_v46 = vadd.f32 %v3575_v23, %v3573_v45 }
 0x1b2   : > { %v1149_v54 = vadd.f32 %v1148_v24, %v1084_v3 }
 0x1b4   : > { %v1213_v53 = vpop.f32.mrf.mxu3  ;;  %v1298_v63 = vpop.f32.mrf.mxu1 }
 0x1b5   : > { %v1214_v55 = vadd.f32 %v1213_v53, %v1149_v54  ;;  %v1299_v40 = vadd.f32 %v1298_v63, %v1234_v44  ;;  %v1249_v53 = vadd.f32 %v3586_v42, %v3584_v31 }
 0x1b6   : > { %v1278_v20 = vpop.f32.mrf.mxu0 }
 0x1b7   : > { %v3722_v61 = vadd.f32 %v1278_v20, %v1214_v55 }
 0x1b9   : > { %1537 = vmatmul.f32.gmra.mxu0 %v809_v26  ;;  %v1363_v18 = vpop.f32.mrf.mxu2 }
 0x1ba   : > { %v1364_v59 = vadd.f32 %v1363_v18, %v1299_v40  ;;  %v1252_v18 = vadd.f32 %v3597_v58, %v3595_v57 }
 0x1bc   : > { %v1301_v37 = vpop.f32.mrf.mxu1  ;;  %v1428_v29 = vpop.f32.mrf.mxu3 }
 0x1bd   : > { %v1429_v8 = vadd.f32 %v1428_v29, %v1364_v59  ;;  %v1302_v2 = vadd.f32 %v1301_v37, %v1237_v60 }
 0x1be   : > { %v1493_v22 = vpop.f32.mrf.mxu0 }
 0x1bf   : > { %v1494_v34 = vadd.f32 %v1493_v22, %v1429_v8 }
 0x1c1   : > { %1541 = vst [vmem:[%s2130_s11] sm:$0xff] %v1494_v34  ;;  %v1366_v10 = vpop.f32.mrf.mxu2  ;;  %v1255_v34 = vadd.f32 %v3608_v7, %v3606_v62 }
 0x1c2   : > { %v1367_v28 = vadd.f32 %v1366_v10, %v1302_v2 }
 0x1c4   : > { %v1304_v12 = vpop.f32.mrf.mxu1  ;;  %v1431_v25 = vpop.f32.mrf.mxu3 }
 0x1c5   : > { %v1432_v0 = vadd.f32 %v1431_v25, %v1367_v28  ;;  %v1305_v50 = vadd.f32 %v1304_v12, %v1240_v14 }
 0x1c6   : > { %v1496_v4 = vpop.f32.mrf.mxu0 }
 0x1c7   : > { %v1497_v51 = vadd.f32 %v1496_v4, %v1432_v0 }
 0x1c9   : > { %1542 = vst [vmem:[%s2130_s11 + $0x8] sm:$0xff] %v1497_v51  ;;  %v1369_v36 = vpop.f32.mrf.mxu2 }
 0x1ca   : > { %v1370_v21 = vadd.f32 %v1369_v36, %v1305_v50 }
 0x1cc   : > { %v1307_v15 = vpop.f32.mrf.mxu1  ;;  %v1434_v30 = vpop.f32.mrf.mxu3 }
 0x1cd   : > { %v1435_v56 = vadd.f32 %v1434_v30, %v1370_v21  ;;  %v1308_v33 = vadd.f32 %v1307_v15, %v1243_v6 }
 0x1ce   : > { %v1499_v32 = vpop.f32.mrf.mxu0 }
 0x1cf   : > { %v1500_v47 = vadd.f32 %v1499_v32, %v1435_v56 }
 0x1d1   : > { %1543 = vst [vmem:[%s2130_s11 + $0x10] sm:$0xff] %v1500_v47  ;;  %v1372_v19 = vpop.f32.mrf.mxu2 }
 0x1d2   : > { %v1373_v43 = vadd.f32 %v1372_v19, %v1308_v33 }
 0x1d4   : > { %v1310_v48 = vpop.f32.mrf.mxu1  ;;  %v1437_v38 = vpop.f32.mrf.mxu3 }
 0x1d5   : > { %v1438_v1 = vadd.f32 %v1437_v38, %v1373_v43  ;;  %v1311_v3 = vadd.f32 %v1310_v48, %v1246_v46 }
 0x1d6   : > { %v1502_v35 = vpop.f32.mrf.mxu0 }
 0x1d7   : > { %v1503_v11 = vadd.f32 %v1502_v35, %v1438_v1 }
 0x1d9   : > { %1544 = vst [vmem:[%s2130_s11 + $0x18] sm:$0xff] %v1503_v11  ;;  %v1375_v24 = vpop.f32.mrf.mxu2 }
 0x1da   : > { %v1376_v54 = vadd.f32 %v1375_v24, %v1311_v3 }
 0x1dc   : > { %v1313_v39 = vpop.f32.mrf.mxu1  ;;  %v1440_v49 = vpop.f32.mrf.mxu3 }
 0x1dd   : > { %v1441_v27 = vadd.f32 %v1440_v49, %v1376_v54  ;;  %v1314_v44 = vadd.f32 %v1313_v39, %v1249_v53 }
 0x1de   : > { %v1505_v63 = vpop.f32.mrf.mxu0 }
 0x1df   : > { %v1506_v55 = vadd.f32 %v1505_v63, %v1441_v27 }
 0x1e1   : > { %1545 = vst [vmem:[%s2130_s11 + $0x20] sm:$0xff] %v1506_v55  ;;  %v1378_v20 = vpop.f32.mrf.mxu2 }
 0x1e2   : > { %v1379_v26 = vadd.f32 %v1378_v20, %v1314_v44 }
 0x1e4   : > { %v1316_v45 = vpop.f32.mrf.mxu1  ;;  %v1443_v23 = vpop.f32.mrf.mxu3 }
 0x1e5   : > { %v1444_v40 = vadd.f32 %v1443_v23, %v1379_v26  ;;  %v1317_v29 = vadd.f32 %v1316_v45, %v1252_v18 }
 0x1e6   : > { %v1508_v59 = vpop.f32.mrf.mxu0 }
 0x1e7   : > { %v1509_v37 = vadd.f32 %v1508_v59, %v1444_v40 }
 0x1e9   : > { %1546 = vst [vmem:[%s2130_s11 + $0x28] sm:$0xff] %v1509_v37  ;;  %v1381_v8 = vpop.f32.mrf.mxu2 }
 0x1ea   : > { %v1382_v60 = vadd.f32 %v1381_v8, %v1317_v29 }
 0x1ec   : > { %v1319_v31 = vpop.f32.mrf.mxu1  ;;  %v1446_v42 = vpop.f32.mrf.mxu3 }
 0x1ed   : > { %v1447_v22 = vadd.f32 %v1446_v42, %v1382_v60  ;;  %v1320_v28 = vadd.f32 %v1319_v31, %v1255_v34 }
 0x1ee   : > { %v1511_v2 = vpop.f32.mrf.mxu0 }
 0x1ef   : > { %v1512_v10 = vadd.f32 %v1511_v2, %v1447_v22 }
 0x1f1   : > { %1547 = vst [vmem:[%s2130_s11 + $0x30] sm:$0xff] %v1512_v10  ;;  %v1384_v12 = vpop.f32.mrf.mxu2 }
 0x1f2   : > { %v1385_v25 = vadd.f32 %v1384_v12, %v1320_v28 }
 0x1f4   : > { %v1322_v57 = vpop.f32.mrf.mxu1  ;;  %v1449_v58 = vpop.f32.mrf.mxu3 }
 0x1f5   : > { %v1450_v0 = vadd.f32 %v1449_v58, %v1385_v25  ;;  %v1323_v51 = vadd.f32 %v1322_v57, %v3622_v52 }
 0x1f6   : > { %v1514_v14 = vpop.f32.mrf.mxu0 }
 0x1f7   : > { %v1515_v4 = vadd.f32 %v1514_v14, %v1450_v0 }
 0x1f9   : > { %1548 = vst [vmem:[%s2130_s11 + $0x38] sm:$0xff] %v1515_v4  ;;  %v1387_v50 = vpop.f32.mrf.mxu2 }
 0x1fa   : > { %v1388_v36 = vadd.f32 %v1387_v50, %v1323_v51 }
 0x1fc   : > { %v1325_v21 = vpop.f32.mrf.mxu1  ;;  %v1452_v62 = vpop.f32.mrf.mxu3 }
 0x1fd   : > { %v1453_v7 = vadd.f32 %v1452_v62, %v1388_v36  ;;  %v1326_v56 = vadd.f32 %v1325_v21, %v3636_v41 }
 0x1fe   : > { %v1517_v15 = vpop.f32.mrf.mxu0 }
 0x1ff   : > { %v1518_v30 = vadd.f32 %v1517_v15, %v1453_v7 }
 0x201   : > { %1549 = vst [vmem:[%s2130_s11 + $0x40] sm:$0xff] %v1518_v30  ;;  %v1390_v6 = vpop.f32.mrf.mxu2 }
 0x202   : > { %v1391_v32 = vadd.f32 %v1390_v6, %v1326_v56 }
 0x204   : > { %v1328_v47 = vpop.f32.mrf.mxu1  ;;  %v1455_v33 = vpop.f32.mrf.mxu3 }
 0x205   : > { %v1456_v19 = vadd.f32 %v1455_v33, %v1391_v32  ;;  %v1329_v48 = vadd.f32 %v1328_v47, %v3645_v17 }
 0x206   : > { %v1520_v43 = vpop.f32.mrf.mxu0 }
 0x207   : > { %v1521_v52 = vadd.f32 %v1520_v43, %v1456_v19 }
 0x209   : > { %1550 = vst [vmem:[%s2130_s11 + $0x48] sm:$0xff] %v1521_v52  ;;  %v1393_v38 = vpop.f32.mrf.mxu2 }
 0x20a   : > { %v1394_v1 = vadd.f32 %v1393_v38, %v1329_v48 }
 0x20c   : > { %v1331_v46 = vpop.f32.mrf.mxu1  ;;  %v1458_v35 = vpop.f32.mrf.mxu3 }
 0x20d   : > { %v1459_v11 = vadd.f32 %v1458_v35, %v1394_v1  ;;  %v1332_v24 = vadd.f32 %v1331_v46, %v3659_v13 }
 0x20e   : > { %v1523_v3 = vpop.f32.mrf.mxu0 }
 0x20f   : > { %v1524_v41 = vadd.f32 %v1523_v3, %v1459_v11 }
 0x211   : > { %1551 = vst [vmem:[%s2130_s11 + $0x50] sm:$0xff] %v1524_v41  ;;  %v1396_v54 = vpop.f32.mrf.mxu2 }
 0x212   : > { %v1397_v39 = vadd.f32 %v1396_v54, %v1332_v24 }
 0x214   : > { %v1334_v49 = vpop.f32.mrf.mxu1  ;;  %v1461_v27 = vpop.f32.mrf.mxu3 }
 0x215   : > { %v1462_v53 = vadd.f32 %v1461_v27, %v1397_v39  ;;  %v1335_v55 = vadd.f32 %v1334_v49, %v3686_v5 }
 0x216   : > { %v1526_v63 = vpop.f32.mrf.mxu0 }
 0x217   : > { %v1527_v17 = vadd.f32 %v1526_v63, %v1462_v53 }
 0x219   : > { %1552 = vst [vmem:[%s2130_s11 + $0x58] sm:$0xff] %v1527_v17  ;;  %v1399_v44 = vpop.f32.mrf.mxu2 }
 0x21a   : > { %v1400_v20 = vadd.f32 %v1399_v44, %v1335_v55 }
 0x21c   : > { %v1337_v26 = vpop.f32.mrf.mxu1  ;;  %v1464_v45 = vpop.f32.mrf.mxu3 }
 0x21d   : > { %v1465_v13 = vadd.f32 %v1464_v45, %v1400_v20  ;;  %v1338_v18 = vadd.f32 %v1337_v26, %v3708_v16 }
 0x21e   : > { %v1529_v23 = vpop.f32.mrf.mxu0 }
 0x21f   : > { %v1530_v40 = vadd.f32 %v1529_v23, %v1465_v13 }
 0x221   : > { %1553 = vst [vmem:[%s2130_s11 + $0x60] sm:$0xff] %v1530_v40  ;;  %v1402_v59 = vpop.f32.mrf.mxu2 }
 0x222   : > { %v1403_v37 = vadd.f32 %v1402_v59, %v1338_v18 }
 0x224   : > { %v1340_v29 = vpop.f32.mrf.mxu1  ;;  %v1467_v8 = vpop.f32.mrf.mxu3 }
 0x225   : > { %v1468_v60 = vadd.f32 %v1467_v8, %v1403_v37  ;;  %v1341_v42 = vadd.f32 %v1340_v29, %v3716_v9 }
 0x226   : > { %v1532_v5 = vpop.f32.mrf.mxu0 }
 0x227   : > { %v1533_v31 = vadd.f32 %v1532_v5, %v1468_v60 }
 0x229   : > { %1554 = vst [vmem:[%s2130_s11 + $0x68] sm:$0xff] %v1533_v31  ;;  %v1405_v22 = vpop.f32.mrf.mxu2 }
 0x22a   : > { %v1406_v34 = vadd.f32 %v1405_v22, %v1341_v42 }
 0x22c   : > { %v1470_v2 = vpop.f32.mrf.mxu3  ;;  %v1343_v16 = vpop.f32.mrf.mxu1 }
 0x22d   : > { %v1471_v10 = vadd.f32 %v1470_v2, %v1406_v34  ;;  %v1344_v25 = vadd.f32 %v1343_v16, %v3722_v61 }
 0x22e   : > { %v1535_v28 = vpop.f32.mrf.mxu0 }
 0x22f   : > { %v1536_v12 = vadd.f32 %v1535_v28, %v1471_v10 }
 0x231   : > { %1555 = vst [vmem:[%s2130_s11 + $0x70] sm:$0xff] %v1536_v12  ;;  %v1408_v9 = vpop.f32.mrf.mxu2 }
 0x232   : > { %v1409_v57 = vadd.f32 %v1408_v9, %v1344_v25 }
 0x234   : > { %v1473_v58 = vpop.f32.mrf.mxu3 }
 0x235   : > { %v1474_v0 = vadd.f32 %v1473_v58, %v1409_v57 }
 0x236   : > { %v1538_v14 = vpop.f32.mrf.mxu0 }
 0x237   : > { %v1539_v4 = vadd.f32 %v1538_v14, %v1474_v0 }
 0x239   : > { %1556 = vst [vmem:[%s2130_s11 + $0x78] sm:$0xff] %v1539_v4 }
 0x23a   : > { %1957 = shalt.err (!%p1954_p10)
}
 0x23b   : > { %s2028_s11 = smov 128   ;;  %s2029_s6 = smov 8  }
 0x23c   : > { %1853 = dma.vmem_to_hbm [thread:$0]  (%p2106_p3), %s1574_s10, 2048, %s1576_s9, %s1558_s27, %s2028_s11, %s2028_s11, %s2029_s6  }
 0x23d PF: > { %p1859_p11 = scmp.ge.s32.totalorder %s2026_s22, 2  ;;  %s1590_s18 = sand.u32 1, %s1998_s15  }
 0x23e   : > { %s1591_s19 = scalar_lea.sflag [#allocation5], %s1590_s18 }
 0x23f   : > { %p1856_p12 = pnand %p1859_p11, %p2115_p8 }
 0x241   : > { %p1857_p13 = pneg %p1856_p12 }
 0x243   : > { %1993 = dma.done.wait (%p1857_p13), %s1591_s19, 2048  }
 0x244   : > { %1995 = vsyncadd (%p1857_p13), %s1591_s19, 4294965248  ;;  %s17_s22 = sadd.s32 1, %s2026_s22   ;;  %s4071_s15 = smov %s2002_s16 }
 0x245   : > { %p14_p0 = scmp.ge.s32.totalorder %s17_s22, 6   ;;  %s4072_s16 = smov %s2006_s17 }
 0x246   : > { %s4073_s17 = smov %s2124_s7  ;;  %s4074_s18 = smov %s2018_s20 }
 0x247   : > { %s4075_s19 = smov %s2022_s21  ;;  %s4076_s20 = smov %s4079_s25 }
 0x248   : > { %s4077_s21 = smov %s4083_s26  ;;  %16 = sbr.rel (!%p14_p0) target bundleno = 5 (0x5), region = 143 }
 0x24d   :  { %1597 = vsyncpa [#allocation5], 1 }
 0x24e   :  { %1599 = vsyncpa [#allocation5 + $0x1], 1 }
 0x24f   :  { %1600 = vsyncmov [#allocation3] }
 0x252   :  { %s1601_s28 = vpop.sfrf %1600 }
 0x253   :  { %p1802_p3 = scmp.ne.s32.totalorder %s1601_s28, 0 }
 0x255   :  { %1605 = shalt.err (%p1802_p3)  }
 0x256   :  { %1607 = vsyncmov [#allocation3 + $0x1] }
 0x259   :  { %s1608_s29 = vpop.sfrf %1607 }
 0x25a   :  { %p1803_p8 = scmp.ne.s32.totalorder %s1608_s29, 0 }
 0x25c   :  { %1612 = shalt.err (%p1803_p8)  }

</bundles_post_ra>
